<compile_context>
chip_gen: v6e
topology: v6e:2x2x1
jax: 0.10.0
libtpu: 0.0.40
codegen_flags: <defaults>
</compile_context>

<pallas_src>
import numpy as np
import jax
import jax.numpy as jnp
from jax.experimental import pallas as pl
from jax.experimental.pallas import tpu as pltpu

# ---- small config consistent with UMPNN.__init__ ----------------------------
NUM_NODES = 4            # len(configuration.asset_names)
INPUT_DIM = 8            # input_dim
HIDDEN_DIM = 32          # hidden_dim == configuration.message_out
MESSAGE_OUT = HIDDEN_DIM
N_LAYERS = 1
MLP_HIDDEN = 128         # update_mlp_lin1 out-features / LayerNorm(128)
LN_EPS = 1e-5


# -----------------------------------------------------------------------------
# Kernel
# -----------------------------------------------------------------------------
def umpnn_kernel(feat_ref, c0_ref, w_ref, b_ref, w1p_ref,
                 gamma_ref, beta_ref, w2_ref, out_ref):
    # feat_ref : (1, B, F)    per-step rows [x[gather_id] | h0],  B = E + N, F = D + H
    # c0_ref   : (1, 1, H)    per-step shared LSTM c0
    # w_ref    : (F, B, 4H)   fused [Wih | Whh] of all E+N LSTMs, gate axis on lanes,
    #                         gate order (i, f, o, g)                       [resident]
    # b_ref    : (B, 4H)      pre-summed bias_ih + bias_hh, same gate order [resident]
    # w1p_ref  : (H, 2N, 128) packed update_mlp_lin1: sublanes 0..N-1 local,
    #                         N..2N-1 message halves                        [resident]
    # gamma/beta/w2 : (N, 128)                                              [resident]
    # out_ref  : (1, N, 1)
    B = feat_ref.shape[1]
    F = feat_ref.shape[2]
    H = c0_ref.shape[2]
    N = gamma_ref.shape[0]
    E = B - N
    indeg = E // N
    P = 4                                    # interleaved partial accumulators

    feat = feat_ref[0]                       # (B, F)

    # ---- fused batched LSTM pre-activations (B = E + N rows), lane-dense (B, 4H) ----
    # gates[b, :] = sum_j w[j, b, :] * feat[b, j]  + bias   (F >= P, unrolled VPU FMAs,
    # split over P accumulators to break the serial add-latency chain)
    acc = [None] * P
    for j in range(F):
        v = w_ref[j] * feat[:, j:j + 1]      # (B, 4H) * (B, 1) lane-broadcast FMA
        acc[j % P] = v if acc[j % P] is None else acc[j % P] + v
    gates = (b_ref[...] + acc[0]) + ((acc[1] + acc[2]) + acc[3])   # (B, 4H)

    # ---- activations: gate order (i, f, o, g) -> one contiguous sigmoid + one tanh ----
    sig = jax.nn.sigmoid(gates[:, 0:3 * H])
    i = sig[:, 0:H]
    f = sig[:, H:2 * H]
    o = sig[:, 2 * H:3 * H]
    g = jnp.tanh(gates[:, 3 * H:4 * H])
    c0 = c0_ref[0]                           # (1, H) broadcast over the B rows
    c = f * c0 + i * g
    hout = o * jnp.tanh(c)                   # (B, H): rows 0..E-1 = msgs, E.. = local

    # ---- scatter-add via edge sort: row d*N + n holds the d-th message into node n ----
    allm = hout[0:N, :]
    for d in range(1, indeg):
        allm = allm + hout[d * N:(d + 1) * N, :]          # 2 sublane-slice adds
    local = hout[E:E + N, :]                               # (N, H)

    # ---- sublane-packed MLP lin1: z is (2N, H); one full (2N, 128) FMA per k ----
    z = jnp.concatenate([local, allm], axis=0)             # (2N, H)
    hac = [None] * P                                       # H >= P
    for k in range(H):
        v = w1p_ref[k] * z[:, k:k + 1]                     # (2N, 128) * (2N, 1)
        hac[k % P] = v if hac[k % P] is None else hac[k % P] + v
    h1p = (hac[0] + hac[1]) + (hac[2] + hac[3])            # (2N, 128)
    h1 = h1p[0:N, :] + h1p[N:2 * N, :]                     # fold local / message halves

    # ---- LayerNorm(128) -> ReLU -> Linear(128, 1) ----
    mean = jnp.mean(h1, axis=-1, keepdims=True)
    var = jnp.mean((h1 - mean) ** 2, axis=-1, keepdims=True)
    h1 = (h1 - mean) * jax.lax.rsqrt(var + LN_EPS)
    h1 = h1 * gamma_ref[...] + beta_ref[...]
    h1 = jnp.maximum(h1, 0.0)
    out_ref[0] = jnp.sum(h1 * w2_ref[...], axis=-1, keepdims=True)   # (N, 1)


# -----------------------------------------------------------------------------
# One-time host-side parameter repack + static graph preprocessing
# -----------------------------------------------------------------------------
def prepare(params, edge_index, N, H):
    tgt = np.asarray(edge_index[0])
    src = np.asarray(edge_index[1])
    E = tgt.shape[0]
    indeg = np.bincount(tgt, minlength=N)
    # TODO(synk): non-uniform in-degree graphs need padded edge batches for this layout.
    assert int(indeg.min()) == int(indeg.max()), "edge-sorted scatter needs uniform in-degree"

    # edge permutation: new row r = d*N + target  (d = rank among edges with that target)
    perm = np.zeros(E, np.int64)
    counts = np.zeros(N, np.int64)
    for e in range(E):
        t = int(tgt[e])
        perm[counts[t] * N + t] = e
        counts[t] += 1

    # gate reorder: torch (i, f, g, o) -> (i, f, o, g) (contiguous sigmoid region)
    gp = np.concatenate([np.arange(0, 2 * H), np.arange(3 * H, 4 * H), np.arange(2 * H, 3 * H)])

    wih = jnp.concatenate([params["wih_m"][perm], params["wih_u"]], axis=0)[:, gp, :]   # (B,4H,D)
    whh = jnp.concatenate([params["whh_m"][perm], params["whh_u"]], axis=0)[:, gp, :]   # (B,4H,H)
    b = jnp.concatenate([params["bih_m"][perm] + params["bhh_m"][perm],
                         params["bih_u"] + params["bhh_u"]], axis=0)[:, gp]             # (B,4H)
    # fuse [Wih | Whh] along the input axis and put it leading, gate axis on lanes
    w = jnp.transpose(jnp.concatenate([wih, whh], axis=2), (2, 0, 1))                   # (D+H,B,4H)

    w1 = params["w1"]                                                                   # (N,128,2H)
    w1p = jnp.concatenate([jnp.transpose(w1[:, :, :H], (2, 0, 1)),      # local half
                           jnp.transpose(w1[:, :, H:], (2, 0, 1))],     # message half
                          axis=1)                                                       # (H,2N,128)

    gather_ids = jnp.asarray(np.concatenate([src[perm], np.arange(N)]), jnp.int32)      # (B,)
    return dict(w=w, b=b, w1p=w1p, gamma=params["gamma"], beta=params["beta"],
                w2=params["w2"], gather_ids=gather_ids)


# -----------------------------------------------------------------------------
# Wrappers
# -----------------------------------------------------------------------------
def umpnn_forward_batched(xs, hidden_states, cell_states, prep):
    """xs: (T, N, D); hidden/cell_states: (T, n_layers, 1, H).  Returns (T, N)."""
    T, N, D = xs.shape
    H = hidden_states.shape[-1]
    # TODO(synk): n_layers > 1 not implemented (demo uses n_layers = 1).
    h0 = hidden_states.reshape(T, H)
    c0 = cell_states.reshape(T, 1, H)

    gather_ids = prep["gather_ids"]                             # (B,)
    B = gather_ids.shape[0]
    xg = jnp.take(xs, gather_ids, axis=1)                       # (T, B, D) static-graph gather
    feat = jnp.concatenate(
        [xg, jnp.broadcast_to(h0[:, None, :], (T, B, H))], axis=-1)    # (T, B, D+H)

    F = D + H
    G = prep["b"].shape[1]                                      # 4H
    MLP = prep["gamma"].shape[1]

    per_t = lambda t: (t, 0, 0)
    const3 = lambda t: (0, 0, 0)
    const2 = lambda t: (0, 0)

    out = pl.pallas_call(
        umpnn_kernel,
        out_shape=jax.ShapeDtypeStruct((T, N, 1), jnp.float32),
        grid=(T,),
        in_specs=[
            pl.BlockSpec((1, B, F), per_t),           # feat  (per step)
            pl.BlockSpec((1, 1, H), per_t),           # c0    (per step)
            pl.BlockSpec((F, B, G), const3),          # fused LSTM weights  (resident)
            pl.BlockSpec((B, G), const2),             # fused LSTM bias     (resident)
            pl.BlockSpec((H, 2 * N, MLP), const3),    # packed mlp lin1     (resident)
            pl.BlockSpec((N, MLP), const2),           # gamma               (resident)
            pl.BlockSpec((N, MLP), const2),           # beta                (resident)
            pl.BlockSpec((N, MLP), const2),           # w2                  (resident)
        ],
        out_specs=pl.BlockSpec((1, N, 1), per_t),
        compiler_params=pltpu.CompilerParams(
            dimension_semantics=("parallel",)),
    )(feat, c0, prep["w"], prep["b"], prep["w1p"],
      prep["gamma"], prep["beta"], prep["w2"])
    return out[:, :, 0]                                          # (T, N)


def umpnn_forward(x, hidden_state, cell_state, prep):
    """Single forward call (matches the module's semantics). Returns (N,)."""
    return umpnn_forward_batched(x[None], hidden_state[None], cell_state[None], prep)[0]


# -----------------------------------------------------------------------------
# Pure-JAX reference (mirrors the torch forward loop)
# -----------------------------------------------------------------------------
def reference_forward(x, edge_index, hidden_state, cell_state, p):
    H = HIDDEN_DIM
    h0 = hidden_state[0, 0]
    c0 = cell_state[0, 0]

    def lstm(xv, wih, whh, bih, bhh):
        gates = wih @ xv + bih + whh @ h0 + bhh
        i = jax.nn.sigmoid(gates[0:H]); f = jax.nn.sigmoid(gates[H:2 * H])
        g = jnp.tanh(gates[2 * H:3 * H]); o = jax.nn.sigmoid(gates[3 * H:4 * H])
        c = f * c0 + i * g
        return o * jnp.tanh(c)

    E = edge_index.shape[1]
    outs = []
    for n in range(NUM_NODES):
        m = jnp.zeros(MESSAGE_OUT, jnp.float32)
        for e in range(E):
            if int(edge_index[0, e]) == n:
                src = int(edge_index[1, e])
                m = m + lstm(x[src], p["wih_m"][e], p["whh_m"][e], p["bih_m"][e], p["bhh_m"][e])
        loc = lstm(x[n], p["wih_u"][n], p["whh_u"][n], p["bih_u"][n], p["bhh_u"][n])
        z = jnp.concatenate([loc, m])
        h1 = p["w1"][n] @ z
        mu = jnp.mean(h1); var = jnp.mean((h1 - mu) ** 2)
        h1 = (h1 - mu) / jnp.sqrt(var + LN_EPS) * p["gamma"][n] + p["beta"][n]
        h1 = jnp.maximum(h1, 0.0)
        outs.append(jnp.sum(p["w2"][n] * h1))
    return jnp.stack(outs)


def init_params(key, N, E, D, H):
    ks = jax.random.split(key, 12)
    s = 0.2
    return {
        "wih_m": s * jax.random.normal(ks[0], (E, 4 * H, D), jnp.float32),
        "whh_m": s * jax.random.normal(ks[1], (E, 4 * H, H), jnp.float32),
        "bih_m": s * jax.random.normal(ks[2], (E, 4 * H), jnp.float32),
        "bhh_m": s * jax.random.normal(ks[3], (E, 4 * H), jnp.float32),
        "wih_u": s * jax.random.normal(ks[4], (N, 4 * H, D), jnp.float32),
        "whh_u": s * jax.random.normal(ks[5], (N, 4 * H, H), jnp.float32),
        "bih_u": s * jax.random.normal(ks[6], (N, 4 * H), jnp.float32),
        "bhh_u": s * jax.random.normal(ks[7], (N, 4 * H), jnp.float32),
        "w1": s * jax.random.normal(ks[8], (N, MLP_HIDDEN, 2 * H), jnp.float32),
        "gamma": 1.0 + 0.1 * jax.random.normal(ks[9], (N, MLP_HIDDEN), jnp.float32),
        "beta": 0.1 * jax.random.normal(ks[10], (N, MLP_HIDDEN), jnp.float32),
        "w2": s * jax.random.normal(ks[11], (N, MLP_HIDDEN), jnp.float32),
    }


if __name__ == "__main__":
    key = jax.random.PRNGKey(0)
    k_par, k_x, k_h, k_c = jax.random.split(key, 4)

    # fully-connected directed graph without self-loops: edge_index[0]=target, [1]=source
    targets, sources = [], []
    for t in range(NUM_NODES):
        for srcn in range(NUM_NODES):
            if srcn != t:
                targets.append(t)
                sources.append(srcn)
    edge_index = jnp.array([targets, sources], dtype=jnp.int32)     # (2, E), E = N*(N-1)
    E = edge_index.shape[1]

    params = init_params(k_par, NUM_NODES, E, INPUT_DIM, HIDDEN_DIM)
    prep = prepare(params, edge_index, NUM_NODES, HIDDEN_DIM)

    # batch of T independent forward calls sharing the grid launch + resident weights
    T = 8
    xs = jax.random.normal(k_x, (T, NUM_NODES, INPUT_DIM), jnp.float32)
    h0s = jax.random.normal(k_h, (T, N_LAYERS, 1, HIDDEN_DIM), jnp.float32)
    c0s = jax.random.normal(k_c, (T, N_LAYERS, 1, HIDDEN_DIM), jnp.float32)

    fwd = jax.jit(umpnn_forward_batched)
    out = jax.block_until_ready(fwd(xs, h0s, c0s, prep))            # (T, NUM_NODES)

    # single-call path (same semantics as the module's forward)
    out1 = jax.block_until_ready(jax.jit(umpnn_forward)(xs[0], h0s[0], c0s[0], prep))

    for t in range(T):
        ref = reference_forward(xs[t], edge_index, h0s[t], c0s[t], params)
        np.testing.assert_allclose(np.asarray(out[t]), np.asarray(ref), rtol=1e-4, atol=1e-4)
    np.testing.assert_allclose(np.asarray(out1), np.asarray(out[0]), rtol=1e-5, atol=1e-5)

    print("KERNEL_OK")
</pallas_src>

<mosaic_0001>
module attributes {stable_mosaic.version = 11 : i64} {
  func.func @umpnn_kernel(%arg0: i32, %arg1: memref<1x16x40xf32, #tpu.memory_space<vmem>>, %arg2: memref<1x1x32xf32, #tpu.memory_space<vmem>>, %arg3: memref<40x16x128xf32, #tpu.memory_space<vmem>>, %arg4: memref<16x128xf32, #tpu.memory_space<vmem>>, %arg5: memref<32x8x128xf32, #tpu.memory_space<vmem>>, %arg6: memref<4x128xf32, #tpu.memory_space<vmem>>, %arg7: memref<4x128xf32, #tpu.memory_space<vmem>>, %arg8: memref<4x128xf32, #tpu.memory_space<vmem>>, %arg9: memref<1x4x1xf32, #tpu.memory_space<vmem>>) attributes {dimension_semantics = [#tpu.dimension_semantics<parallel>], iteration_bounds = array<i64: 8>, scalar_prefetch = 0 : i64, scratch_operands = 0 : i64, tpu.core_type = #tpu.core_type<tc>, window_params = [{transform_indices = @transform_0, window_bounds = array<i64: 1, 16, 40>}, {transform_indices = @transform_1, window_bounds = array<i64: 1, 1, 32>}, {pipeline_mode = #tpu.pipeline_mode<synchronous>, transform_indices = @transform_2, window_bounds = array<i64: 40, 16, 128>}, {pipeline_mode = #tpu.pipeline_mode<synchronous>, transform_indices = @transform_3, window_bounds = array<i64: 16, 128>}, {pipeline_mode = #tpu.pipeline_mode<synchronous>, transform_indices = @transform_4, window_bounds = array<i64: 32, 8, 128>}, {pipeline_mode = #tpu.pipeline_mode<synchronous>, transform_indices = @transform_5, window_bounds = array<i64: 4, 128>}, {pipeline_mode = #tpu.pipeline_mode<synchronous>, transform_indices = @transform_6, window_bounds = array<i64: 4, 128>}, {pipeline_mode = #tpu.pipeline_mode<synchronous>, transform_indices = @transform_7, window_bounds = array<i64: 4, 128>}, {transform_indices = @transform_8, window_bounds = array<i64: 1, 4, 1>}]} {
    %c0 = arith.constant 0 : index
    %c0_0 = arith.constant 0 : index
    %c0_1 = arith.constant 0 : index
    %0 = vector.load %arg1[%c0, %c0_0, %c0_1] : memref<1x16x40xf32, #tpu.memory_space<vmem>>, vector<1x16x40xf32>
    %1 = vector.shape_cast %0 : vector<1x16x40xf32> to vector<16x40xf32>
    %c0_2 = arith.constant 0 : index
    %c0_3 = arith.constant 0 : index
    %c0_4 = arith.constant 0 : index
    %2 = vector.load %arg3[%c0_2, %c0_3, %c0_4] : memref<40x16x128xf32, #tpu.memory_space<vmem>>, vector<1x16x128xf32>
    %3 = vector.shape_cast %2 : vector<1x16x128xf32> to vector<16x128xf32>
    %4 = vector.extract_strided_slice %1 {offsets = [0, 0], sizes = [16, 1], strides = [1, 1]} : vector<16x40xf32> to vector<16x1xf32>
    %5 = vector.broadcast %4 : vector<16x1xf32> to vector<16x128xf32>
    %6 = arith.mulf %3, %5 : vector<16x128xf32>
    %c1 = arith.constant 1 : index
    %c0_5 = arith.constant 0 : index
    %c0_6 = arith.constant 0 : index
    %7 = vector.load %arg3[%c1, %c0_5, %c0_6] : memref<40x16x128xf32, #tpu.memory_space<vmem>>, vector<1x16x128xf32>
    %8 = vector.shape_cast %7 : vector<1x16x128xf32> to vector<16x128xf32>
    %9 = vector.extract_strided_slice %1 {offsets = [0, 1], sizes = [16, 1], strides = [1, 1]} : vector<16x40xf32> to vector<16x1xf32>
    %10 = vector.broadcast %9 : vector<16x1xf32> to vector<16x128xf32>
    %11 = arith.mulf %8, %10 : vector<16x128xf32>
    %c2 = arith.constant 2 : index
    %c0_7 = arith.constant 0 : index
    %c0_8 = arith.constant 0 : index
    %12 = vector.load %arg3[%c2, %c0_7, %c0_8] : memref<40x16x128xf32, #tpu.memory_space<vmem>>, vector<1x16x128xf32>
    %13 = vector.shape_cast %12 : vector<1x16x128xf32> to vector<16x128xf32>
    %14 = vector.extract_strided_slice %1 {offsets = [0, 2], sizes = [16, 1], strides = [1, 1]} : vector<16x40xf32> to vector<16x1xf32>
    %15 = vector.broadcast %14 : vector<16x1xf32> to vector<16x128xf32>
    %16 = arith.mulf %13, %15 : vector<16x128xf32>
    %c3 = arith.constant 3 : index
    %c0_9 = arith.constant 0 : index
    %c0_10 = arith.constant 0 : index
    %17 = vector.load %arg3[%c3, %c0_9, %c0_10] : memref<40x16x128xf32, #tpu.memory_space<vmem>>, vector<1x16x128xf32>
    %18 = vector.shape_cast %17 : vector<1x16x128xf32> to vector<16x128xf32>
    %19 = vector.extract_strided_slice %1 {offsets = [0, 3], sizes = [16, 1], strides = [1, 1]} : vector<16x40xf32> to vector<16x1xf32>
    %20 = vector.broadcast %19 : vector<16x1xf32> to vector<16x128xf32>
    %21 = arith.mulf %18, %20 : vector<16x128xf32>
    %c4 = arith.constant 4 : index
    %c0_11 = arith.constant 0 : index
    %c0_12 = arith.constant 0 : index
    %22 = vector.load %arg3[%c4, %c0_11, %c0_12] : memref<40x16x128xf32, #tpu.memory_space<vmem>>, vector<1x16x128xf32>
    %23 = vector.shape_cast %22 : vector<1x16x128xf32> to vector<16x128xf32>
    %24 = vector.extract_strided_slice %1 {offsets = [0, 4], sizes = [16, 1], strides = [1, 1]} : vector<16x40xf32> to vector<16x1xf32>
    %25 = vector.broadcast %24 : vector<16x1xf32> to vector<16x128xf32>
    %26 = arith.mulf %23, %25 : vector<16x128xf32>
    %27 = arith.addf %6, %26 : vector<16x128xf32>
    %c5 = arith.constant 5 : index
    %c0_13 = arith.constant 0 : index
    %c0_14 = arith.constant 0 : index
    %28 = vector.load %arg3[%c5, %c0_13, %c0_14] : memref<40x16x128xf32, #tpu.memory_space<vmem>>, vector<1x16x128xf32>
    %29 = vector.shape_cast %28 : vector<1x16x128xf32> to vector<16x128xf32>
    %30 = vector.extract_strided_slice %1 {offsets = [0, 5], sizes = [16, 1], strides = [1, 1]} : vector<16x40xf32> to vector<16x1xf32>
    %31 = vector.broadcast %30 : vector<16x1xf32> to vector<16x128xf32>
    %32 = arith.mulf %29, %31 : vector<16x128xf32>
    %33 = arith.addf %11, %32 : vector<16x128xf32>
    %c6 = arith.constant 6 : index
    %c0_15 = arith.constant 0 : index
    %c0_16 = arith.constant 0 : index
    %34 = vector.load %arg3[%c6, %c0_15, %c0_16] : memref<40x16x128xf32, #tpu.memory_space<vmem>>, vector<1x16x128xf32>
    %35 = vector.shape_cast %34 : vector<1x16x128xf32> to vector<16x128xf32>
    %36 = vector.extract_strided_slice %1 {offsets = [0, 6], sizes = [16, 1], strides = [1, 1]} : vector<16x40xf32> to vector<16x1xf32>
    %37 = vector.broadcast %36 : vector<16x1xf32> to vector<16x128xf32>
    %38 = arith.mulf %35, %37 : vector<16x128xf32>
    %39 = arith.addf %16, %38 : vector<16x128xf32>
    %c7 = arith.constant 7 : index
    %c0_17 = arith.constant 0 : index
    %c0_18 = arith.constant 0 : index
    %40 = vector.load %arg3[%c7, %c0_17, %c0_18] : memref<40x16x128xf32, #tpu.memory_space<vmem>>, vector<1x16x128xf32>
    %41 = vector.shape_cast %40 : vector<1x16x128xf32> to vector<16x128xf32>
    %42 = vector.extract_strided_slice %1 {offsets = [0, 7], sizes = [16, 1], strides = [1, 1]} : vector<16x40xf32> to vector<16x1xf32>
    %43 = vector.broadcast %42 : vector<16x1xf32> to vector<16x128xf32>
    %44 = arith.mulf %41, %43 : vector<16x128xf32>
    %45 = arith.addf %21, %44 : vector<16x128xf32>
    %c8 = arith.constant 8 : index
    %c0_19 = arith.constant 0 : index
    %c0_20 = arith.constant 0 : index
    %46 = vector.load %arg3[%c8, %c0_19, %c0_20] : memref<40x16x128xf32, #tpu.memory_space<vmem>>, vector<1x16x128xf32>
    %47 = vector.shape_cast %46 : vector<1x16x128xf32> to vector<16x128xf32>
    %48 = vector.extract_strided_slice %1 {offsets = [0, 8], sizes = [16, 1], strides = [1, 1]} : vector<16x40xf32> to vector<16x1xf32>
    %49 = vector.broadcast %48 : vector<16x1xf32> to vector<16x128xf32>
    %50 = arith.mulf %47, %49 : vector<16x128xf32>
    %51 = arith.addf %27, %50 : vector<16x128xf32>
    %c9 = arith.constant 9 : index
    %c0_21 = arith.constant 0 : index
    %c0_22 = arith.constant 0 : index
    %52 = vector.load %arg3[%c9, %c0_21, %c0_22] : memref<40x16x128xf32, #tpu.memory_space<vmem>>, vector<1x16x128xf32>
    %53 = vector.shape_cast %52 : vector<1x16x128xf32> to vector<16x128xf32>
    %54 = vector.extract_strided_slice %1 {offsets = [0, 9], sizes = [16, 1], strides = [1, 1]} : vector<16x40xf32> to vector<16x1xf32>
    %55 = vector.broadcast %54 : vector<16x1xf32> to vector<16x128xf32>
    %56 = arith.mulf %53, %55 : vector<16x128xf32>
    %57 = arith.addf %33, %56 : vector<16x128xf32>
    %c10 = arith.constant 10 : index
    %c0_23 = arith.constant 0 : index
    %c0_24 = arith.constant 0 : index
    %58 = vector.load %arg3[%c10, %c0_23, %c0_24] : memref<40x16x128xf32, #tpu.memory_space<vmem>>, vector<1x16x128xf32>
    %59 = vector.shape_cast %58 : vector<1x16x128xf32> to vector<16x128xf32>
    %60 = vector.extract_strided_slice %1 {offsets = [0, 10], sizes = [16, 1], strides = [1, 1]} : vector<16x40xf32> to vector<16x1xf32>
    %61 = vector.broadcast %60 : vector<16x1xf32> to vector<16x128xf32>
    %62 = arith.mulf %59, %61 : vector<16x128xf32>
    %63 = arith.addf %39, %62 : vector<16x128xf32>
    %c11 = arith.constant 11 : index
    %c0_25 = arith.constant 0 : index
    %c0_26 = arith.constant 0 : index
    %64 = vector.load %arg3[%c11, %c0_25, %c0_26] : memref<40x16x128xf32, #tpu.memory_space<vmem>>, vector<1x16x128xf32>
    %65 = vector.shape_cast %64 : vector<1x16x128xf32> to vector<16x128xf32>
    %66 = vector.extract_strided_slice %1 {offsets = [0, 11], sizes = [16, 1], strides = [1, 1]} : vector<16x40xf32> to vector<16x1xf32>
    %67 = vector.broadcast %66 : vector<16x1xf32> to vector<16x128xf32>
    %68 = arith.mulf %65, %67 : vector<16x128xf32>
    %69 = arith.addf %45, %68 : vector<16x128xf32>
    %c12 = arith.constant 12 : index
    %c0_27 = arith.constant 0 : index
    %c0_28 = arith.constant 0 : index
    %70 = vector.load %arg3[%c12, %c0_27, %c0_28] : memref<40x16x128xf32, #tpu.memory_space<vmem>>, vector<1x16x128xf32>
    %71 = vector.shape_cast %70 : vector<1x16x128xf32> to vector<16x128xf32>
    %72 = vector.extract_strided_slice %1 {offsets = [0, 12], sizes = [16, 1], strides = [1, 1]} : vector<16x40xf32> to vector<16x1xf32>
    %73 = vector.broadcast %72 : vector<16x1xf32> to vector<16x128xf32>
    %74 = arith.mulf %71, %73 : vector<16x128xf32>
    %75 = arith.addf %51, %74 : vector<16x128xf32>
    %c13 = arith.constant 13 : index
    %c0_29 = arith.constant 0 : index
    %c0_30 = arith.constant 0 : index
    %76 = vector.load %arg3[%c13, %c0_29, %c0_30] : memref<40x16x128xf32, #tpu.memory_space<vmem>>, vector<1x16x128xf32>
    %77 = vector.shape_cast %76 : vector<1x16x128xf32> to vector<16x128xf32>
    %78 = vector.extract_strided_slice %1 {offsets = [0, 13], sizes = [16, 1], strides = [1, 1]} : vector<16x40xf32> to vector<16x1xf32>
    %79 = vector.broadcast %78 : vector<16x1xf32> to vector<16x128xf32>
    %80 = arith.mulf %77, %79 : vector<16x128xf32>
    %81 = arith.addf %57, %80 : vector<16x128xf32>
    %c14 = arith.constant 14 : index
    %c0_31 = arith.constant 0 : index
    %c0_32 = arith.constant 0 : index
    %82 = vector.load %arg3[%c14, %c0_31, %c0_32] : memref<40x16x128xf32, #tpu.memory_space<vmem>>, vector<1x16x128xf32>
    %83 = vector.shape_cast %82 : vector<1x16x128xf32> to vector<16x128xf32>
    %84 = vector.extract_strided_slice %1 {offsets = [0, 14], sizes = [16, 1], strides = [1, 1]} : vector<16x40xf32> to vector<16x1xf32>
    %85 = vector.broadcast %84 : vector<16x1xf32> to vector<16x128xf32>
    %86 = arith.mulf %83, %85 : vector<16x128xf32>
    %87 = arith.addf %63, %86 : vector<16x128xf32>
    %c15 = arith.constant 15 : index
    %c0_33 = arith.constant 0 : index
    %c0_34 = arith.constant 0 : index
    %88 = vector.load %arg3[%c15, %c0_33, %c0_34] : memref<40x16x128xf32, #tpu.memory_space<vmem>>, vector<1x16x128xf32>
    %89 = vector.shape_cast %88 : vector<1x16x128xf32> to vector<16x128xf32>
    %90 = vector.extract_strided_slice %1 {offsets = [0, 15], sizes = [16, 1], strides = [1, 1]} : vector<16x40xf32> to vector<16x1xf32>
    %91 = vector.broadcast %90 : vector<16x1xf32> to vector<16x128xf32>
    %92 = arith.mulf %89, %91 : vector<16x128xf32>
    %93 = arith.addf %69, %92 : vector<16x128xf32>
    %c16 = arith.constant 16 : index
    %c0_35 = arith.constant 0 : index
    %c0_36 = arith.constant 0 : index
    %94 = vector.load %arg3[%c16, %c0_35, %c0_36] : memref<40x16x128xf32, #tpu.memory_space<vmem>>, vector<1x16x128xf32>
    %95 = vector.shape_cast %94 : vector<1x16x128xf32> to vector<16x128xf32>
    %96 = vector.extract_strided_slice %1 {offsets = [0, 16], sizes = [16, 1], strides = [1, 1]} : vector<16x40xf32> to vector<16x1xf32>
    %97 = vector.broadcast %96 : vector<16x1xf32> to vector<16x128xf32>
    %98 = arith.mulf %95, %97 : vector<16x128xf32>
    %99 = arith.addf %75, %98 : vector<16x128xf32>
    %c17 = arith.constant 17 : index
    %c0_37 = arith.constant 0 : index
    %c0_38 = arith.constant 0 : index
    %100 = vector.load %arg3[%c17, %c0_37, %c0_38] : memref<40x16x128xf32, #tpu.memory_space<vmem>>, vector<1x16x128xf32>
    %101 = vector.shape_cast %100 : vector<1x16x128xf32> to vector<16x128xf32>
    %102 = vector.extract_strided_slice %1 {offsets = [0, 17], sizes = [16, 1], strides = [1, 1]} : vector<16x40xf32> to vector<16x1xf32>
    %103 = vector.broadcast %102 : vector<16x1xf32> to vector<16x128xf32>
    %104 = arith.mulf %101, %103 : vector<16x128xf32>
    %105 = arith.addf %81, %104 : vector<16x128xf32>
    %c18 = arith.constant 18 : index
    %c0_39 = arith.constant 0 : index
    %c0_40 = arith.constant 0 : index
    %106 = vector.load %arg3[%c18, %c0_39, %c0_40] : memref<40x16x128xf32, #tpu.memory_space<vmem>>, vector<1x16x128xf32>
    %107 = vector.shape_cast %106 : vector<1x16x128xf32> to vector<16x128xf32>
    %108 = vector.extract_strided_slice %1 {offsets = [0, 18], sizes = [16, 1], strides = [1, 1]} : vector<16x40xf32> to vector<16x1xf32>
    %109 = vector.broadcast %108 : vector<16x1xf32> to vector<16x128xf32>
    %110 = arith.mulf %107, %109 : vector<16x128xf32>
    %111 = arith.addf %87, %110 : vector<16x128xf32>
    %c19 = arith.constant 19 : index
    %c0_41 = arith.constant 0 : index
    %c0_42 = arith.constant 0 : index
    %112 = vector.load %arg3[%c19, %c0_41, %c0_42] : memref<40x16x128xf32, #tpu.memory_space<vmem>>, vector<1x16x128xf32>
    %113 = vector.shape_cast %112 : vector<1x16x128xf32> to vector<16x128xf32>
    %114 = vector.extract_strided_slice %1 {offsets = [0, 19], sizes = [16, 1], strides = [1, 1]} : vector<16x40xf32> to vector<16x1xf32>
    %115 = vector.broadcast %114 : vector<16x1xf32> to vector<16x128xf32>
    %116 = arith.mulf %113, %115 : vector<16x128xf32>
    %117 = arith.addf %93, %116 : vector<16x128xf32>
    %c20 = arith.constant 20 : index
    %c0_43 = arith.constant 0 : index
    %c0_44 = arith.constant 0 : index
    %118 = vector.load %arg3[%c20, %c0_43, %c0_44] : memref<40x16x128xf32, #tpu.memory_space<vmem>>, vector<1x16x128xf32>
    %119 = vector.shape_cast %118 : vector<1x16x128xf32> to vector<16x128xf32>
    %120 = vector.extract_strided_slice %1 {offsets = [0, 20], sizes = [16, 1], strides = [1, 1]} : vector<16x40xf32> to vector<16x1xf32>
    %121 = vector.broadcast %120 : vector<16x1xf32> to vector<16x128xf32>
    %122 = arith.mulf %119, %121 : vector<16x128xf32>
    %123 = arith.addf %99, %122 : vector<16x128xf32>
    %c21 = arith.constant 21 : index
    %c0_45 = arith.constant 0 : index
    %c0_46 = arith.constant 0 : index
    %124 = vector.load %arg3[%c21, %c0_45, %c0_46] : memref<40x16x128xf32, #tpu.memory_space<vmem>>, vector<1x16x128xf32>
    %125 = vector.shape_cast %124 : vector<1x16x128xf32> to vector<16x128xf32>
    %126 = vector.extract_strided_slice %1 {offsets = [0, 21], sizes = [16, 1], strides = [1, 1]} : vector<16x40xf32> to vector<16x1xf32>
    %127 = vector.broadcast %126 : vector<16x1xf32> to vector<16x128xf32>
    %128 = arith.mulf %125, %127 : vector<16x128xf32>
    %129 = arith.addf %105, %128 : vector<16x128xf32>
    %c22 = arith.constant 22 : index
    %c0_47 = arith.constant 0 : index
    %c0_48 = arith.constant 0 : index
    %130 = vector.load %arg3[%c22, %c0_47, %c0_48] : memref<40x16x128xf32, #tpu.memory_space<vmem>>, vector<1x16x128xf32>
    %131 = vector.shape_cast %130 : vector<1x16x128xf32> to vector<16x128xf32>
    %132 = vector.extract_strided_slice %1 {offsets = [0, 22], sizes = [16, 1], strides = [1, 1]} : vector<16x40xf32> to vector<16x1xf32>
    %133 = vector.broadcast %132 : vector<16x1xf32> to vector<16x128xf32>
    %134 = arith.mulf %131, %133 : vector<16x128xf32>
    %135 = arith.addf %111, %134 : vector<16x128xf32>
    %c23 = arith.constant 23 : index
    %c0_49 = arith.constant 0 : index
    %c0_50 = arith.constant 0 : index
    %136 = vector.load %arg3[%c23, %c0_49, %c0_50] : memref<40x16x128xf32, #tpu.memory_space<vmem>>, vector<1x16x128xf32>
    %137 = vector.shape_cast %136 : vector<1x16x128xf32> to vector<16x128xf32>
    %138 = vector.extract_strided_slice %1 {offsets = [0, 23], sizes = [16, 1], strides = [1, 1]} : vector<16x40xf32> to vector<16x1xf32>
    %139 = vector.broadcast %138 : vector<16x1xf32> to vector<16x128xf32>
    %140 = arith.mulf %137, %139 : vector<16x128xf32>
    %141 = arith.addf %117, %140 : vector<16x128xf32>
    %c24 = arith.constant 24 : index
    %c0_51 = arith.constant 0 : index
    %c0_52 = arith.constant 0 : index
    %142 = vector.load %arg3[%c24, %c0_51, %c0_52] : memref<40x16x128xf32, #tpu.memory_space<vmem>>, vector<1x16x128xf32>
    %143 = vector.shape_cast %142 : vector<1x16x128xf32> to vector<16x128xf32>
    %144 = vector.extract_strided_slice %1 {offsets = [0, 24], sizes = [16, 1], strides = [1, 1]} : vector<16x40xf32> to vector<16x1xf32>
    %145 = vector.broadcast %144 : vector<16x1xf32> to vector<16x128xf32>
    %146 = arith.mulf %143, %145 : vector<16x128xf32>
    %147 = arith.addf %123, %146 : vector<16x128xf32>
    %c25 = arith.constant 25 : index
    %c0_53 = arith.constant 0 : index
    %c0_54 = arith.constant 0 : index
    %148 = vector.load %arg3[%c25, %c0_53, %c0_54] : memref<40x16x128xf32, #tpu.memory_space<vmem>>, vector<1x16x128xf32>
    %149 = vector.shape_cast %148 : vector<1x16x128xf32> to vector<16x128xf32>
    %150 = vector.extract_strided_slice %1 {offsets = [0, 25], sizes = [16, 1], strides = [1, 1]} : vector<16x40xf32> to vector<16x1xf32>
    %151 = vector.broadcast %150 : vector<16x1xf32> to vector<16x128xf32>
    %152 = arith.mulf %149, %151 : vector<16x128xf32>
    %153 = arith.addf %129, %152 : vector<16x128xf32>
    %c26 = arith.constant 26 : index
    %c0_55 = arith.constant 0 : index
    %c0_56 = arith.constant 0 : index
    %154 = vector.load %arg3[%c26, %c0_55, %c0_56] : memref<40x16x128xf32, #tpu.memory_space<vmem>>, vector<1x16x128xf32>
    %155 = vector.shape_cast %154 : vector<1x16x128xf32> to vector<16x128xf32>
    %156 = vector.extract_strided_slice %1 {offsets = [0, 26], sizes = [16, 1], strides = [1, 1]} : vector<16x40xf32> to vector<16x1xf32>
    %157 = vector.broadcast %156 : vector<16x1xf32> to vector<16x128xf32>
    %158 = arith.mulf %155, %157 : vector<16x128xf32>
    %159 = arith.addf %135, %158 : vector<16x128xf32>
    %c27 = arith.constant 27 : index
    %c0_57 = arith.constant 0 : index
    %c0_58 = arith.constant 0 : index
    %160 = vector.load %arg3[%c27, %c0_57, %c0_58] : memref<40x16x128xf32, #tpu.memory_space<vmem>>, vector<1x16x128xf32>
    %161 = vector.shape_cast %160 : vector<1x16x128xf32> to vector<16x128xf32>
    %162 = vector.extract_strided_slice %1 {offsets = [0, 27], sizes = [16, 1], strides = [1, 1]} : vector<16x40xf32> to vector<16x1xf32>
    %163 = vector.broadcast %162 : vector<16x1xf32> to vector<16x128xf32>
    %164 = arith.mulf %161, %163 : vector<16x128xf32>
    %165 = arith.addf %141, %164 : vector<16x128xf32>
    %c28 = arith.constant 28 : index
    %c0_59 = arith.constant 0 : index
    %c0_60 = arith.constant 0 : index
    %166 = vector.load %arg3[%c28, %c0_59, %c0_60] : memref<40x16x128xf32, #tpu.memory_space<vmem>>, vector<1x16x128xf32>
    %167 = vector.shape_cast %166 : vector<1x16x128xf32> to vector<16x128xf32>
    %168 = vector.extract_strided_slice %1 {offsets = [0, 28], sizes = [16, 1], strides = [1, 1]} : vector<16x40xf32> to vector<16x1xf32>
    %169 = vector.broadcast %168 : vector<16x1xf32> to vector<16x128xf32>
    %170 = arith.mulf %167, %169 : vector<16x128xf32>
    %171 = arith.addf %147, %170 : vector<16x128xf32>
    %c29 = arith.constant 29 : index
    %c0_61 = arith.constant 0 : index
    %c0_62 = arith.constant 0 : index
    %172 = vector.load %arg3[%c29, %c0_61, %c0_62] : memref<40x16x128xf32, #tpu.memory_space<vmem>>, vector<1x16x128xf32>
    %173 = vector.shape_cast %172 : vector<1x16x128xf32> to vector<16x128xf32>
    %174 = vector.extract_strided_slice %1 {offsets = [0, 29], sizes = [16, 1], strides = [1, 1]} : vector<16x40xf32> to vector<16x1xf32>
    %175 = vector.broadcast %174 : vector<16x1xf32> to vector<16x128xf32>
    %176 = arith.mulf %173, %175 : vector<16x128xf32>
    %177 = arith.addf %153, %176 : vector<16x128xf32>
    %c30 = arith.constant 30 : index
    %c0_63 = arith.constant 0 : index
    %c0_64 = arith.constant 0 : index
    %178 = vector.load %arg3[%c30, %c0_63, %c0_64] : memref<40x16x128xf32, #tpu.memory_space<vmem>>, vector<1x16x128xf32>
    %179 = vector.shape_cast %178 : vector<1x16x128xf32> to vector<16x128xf32>
    %180 = vector.extract_strided_slice %1 {offsets = [0, 30], sizes = [16, 1], strides = [1, 1]} : vector<16x40xf32> to vector<16x1xf32>
    %181 = vector.broadcast %180 : vector<16x1xf32> to vector<16x128xf32>
    %182 = arith.mulf %179, %181 : vector<16x128xf32>
    %183 = arith.addf %159, %182 : vector<16x128xf32>
    %c31 = arith.constant 31 : index
    %c0_65 = arith.constant 0 : index
    %c0_66 = arith.constant 0 : index
    %184 = vector.load %arg3[%c31, %c0_65, %c0_66] : memref<40x16x128xf32, #tpu.memory_space<vmem>>, vector<1x16x128xf32>
    %185 = vector.shape_cast %184 : vector<1x16x128xf32> to vector<16x128xf32>
    %186 = vector.extract_strided_slice %1 {offsets = [0, 31], sizes = [16, 1], strides = [1, 1]} : vector<16x40xf32> to vector<16x1xf32>
    %187 = vector.broadcast %186 : vector<16x1xf32> to vector<16x128xf32>
    %188 = arith.mulf %185, %187 : vector<16x128xf32>
    %189 = arith.addf %165, %188 : vector<16x128xf32>
    %c32 = arith.constant 32 : index
    %c0_67 = arith.constant 0 : index
    %c0_68 = arith.constant 0 : index
    %190 = vector.load %arg3[%c32, %c0_67, %c0_68] : memref<40x16x128xf32, #tpu.memory_space<vmem>>, vector<1x16x128xf32>
    %191 = vector.shape_cast %190 : vector<1x16x128xf32> to vector<16x128xf32>
    %192 = vector.extract_strided_slice %1 {offsets = [0, 32], sizes = [16, 1], strides = [1, 1]} : vector<16x40xf32> to vector<16x1xf32>
    %193 = vector.broadcast %192 : vector<16x1xf32> to vector<16x128xf32>
    %194 = arith.mulf %191, %193 : vector<16x128xf32>
    %195 = arith.addf %171, %194 : vector<16x128xf32>
    %c33 = arith.constant 33 : index
    %c0_69 = arith.constant 0 : index
    %c0_70 = arith.constant 0 : index
    %196 = vector.load %arg3[%c33, %c0_69, %c0_70] : memref<40x16x128xf32, #tpu.memory_space<vmem>>, vector<1x16x128xf32>
    %197 = vector.shape_cast %196 : vector<1x16x128xf32> to vector<16x128xf32>
    %198 = vector.extract_strided_slice %1 {offsets = [0, 33], sizes = [16, 1], strides = [1, 1]} : vector<16x40xf32> to vector<16x1xf32>
    %199 = vector.broadcast %198 : vector<16x1xf32> to vector<16x128xf32>
    %200 = arith.mulf %197, %199 : vector<16x128xf32>
    %201 = arith.addf %177, %200 : vector<16x128xf32>
    %c34 = arith.constant 34 : index
    %c0_71 = arith.constant 0 : index
    %c0_72 = arith.constant 0 : index
    %202 = vector.load %arg3[%c34, %c0_71, %c0_72] : memref<40x16x128xf32, #tpu.memory_space<vmem>>, vector<1x16x128xf32>
    %203 = vector.shape_cast %202 : vector<1x16x128xf32> to vector<16x128xf32>
    %204 = vector.extract_strided_slice %1 {offsets = [0, 34], sizes = [16, 1], strides = [1, 1]} : vector<16x40xf32> to vector<16x1xf32>
    %205 = vector.broadcast %204 : vector<16x1xf32> to vector<16x128xf32>
    %206 = arith.mulf %203, %205 : vector<16x128xf32>
    %207 = arith.addf %183, %206 : vector<16x128xf32>
    %c35 = arith.constant 35 : index
    %c0_73 = arith.constant 0 : index
    %c0_74 = arith.constant 0 : index
    %208 = vector.load %arg3[%c35, %c0_73, %c0_74] : memref<40x16x128xf32, #tpu.memory_space<vmem>>, vector<1x16x128xf32>
    %209 = vector.shape_cast %208 : vector<1x16x128xf32> to vector<16x128xf32>
    %210 = vector.extract_strided_slice %1 {offsets = [0, 35], sizes = [16, 1], strides = [1, 1]} : vector<16x40xf32> to vector<16x1xf32>
    %211 = vector.broadcast %210 : vector<16x1xf32> to vector<16x128xf32>
    %212 = arith.mulf %209, %211 : vector<16x128xf32>
    %213 = arith.addf %189, %212 : vector<16x128xf32>
    %c36 = arith.constant 36 : index
    %c0_75 = arith.constant 0 : index
    %c0_76 = arith.constant 0 : index
    %214 = vector.load %arg3[%c36, %c0_75, %c0_76] : memref<40x16x128xf32, #tpu.memory_space<vmem>>, vector<1x16x128xf32>
    %215 = vector.shape_cast %214 : vector<1x16x128xf32> to vector<16x128xf32>
    %216 = vector.extract_strided_slice %1 {offsets = [0, 36], sizes = [16, 1], strides = [1, 1]} : vector<16x40xf32> to vector<16x1xf32>
    %217 = vector.broadcast %216 : vector<16x1xf32> to vector<16x128xf32>
    %218 = arith.mulf %215, %217 : vector<16x128xf32>
    %219 = arith.addf %195, %218 : vector<16x128xf32>
    %c37 = arith.constant 37 : index
    %c0_77 = arith.constant 0 : index
    %c0_78 = arith.constant 0 : index
    %220 = vector.load %arg3[%c37, %c0_77, %c0_78] : memref<40x16x128xf32, #tpu.memory_space<vmem>>, vector<1x16x128xf32>
    %221 = vector.shape_cast %220 : vector<1x16x128xf32> to vector<16x128xf32>
    %222 = vector.extract_strided_slice %1 {offsets = [0, 37], sizes = [16, 1], strides = [1, 1]} : vector<16x40xf32> to vector<16x1xf32>
    %223 = vector.broadcast %222 : vector<16x1xf32> to vector<16x128xf32>
    %224 = arith.mulf %221, %223 : vector<16x128xf32>
    %225 = arith.addf %201, %224 : vector<16x128xf32>
    %c38 = arith.constant 38 : index
    %c0_79 = arith.constant 0 : index
    %c0_80 = arith.constant 0 : index
    %226 = vector.load %arg3[%c38, %c0_79, %c0_80] : memref<40x16x128xf32, #tpu.memory_space<vmem>>, vector<1x16x128xf32>
    %227 = vector.shape_cast %226 : vector<1x16x128xf32> to vector<16x128xf32>
    %228 = vector.extract_strided_slice %1 {offsets = [0, 38], sizes = [16, 1], strides = [1, 1]} : vector<16x40xf32> to vector<16x1xf32>
    %229 = vector.broadcast %228 : vector<16x1xf32> to vector<16x128xf32>
    %230 = arith.mulf %227, %229 : vector<16x128xf32>
    %231 = arith.addf %207, %230 : vector<16x128xf32>
    %c39 = arith.constant 39 : index
    %c0_81 = arith.constant 0 : index
    %c0_82 = arith.constant 0 : index
    %232 = vector.load %arg3[%c39, %c0_81, %c0_82] : memref<40x16x128xf32, #tpu.memory_space<vmem>>, vector<1x16x128xf32>
    %233 = vector.shape_cast %232 : vector<1x16x128xf32> to vector<16x128xf32>
    %234 = vector.extract_strided_slice %1 {offsets = [0, 39], sizes = [16, 1], strides = [1, 1]} : vector<16x40xf32> to vector<16x1xf32>
    %235 = vector.broadcast %234 : vector<16x1xf32> to vector<16x128xf32>
    %236 = arith.mulf %233, %235 : vector<16x128xf32>
    %237 = arith.addf %213, %236 : vector<16x128xf32>
    %c0_83 = arith.constant 0 : index
    %c0_84 = arith.constant 0 : index
    %238 = vector.load %arg4[%c0_83, %c0_84] : memref<16x128xf32, #tpu.memory_space<vmem>>, vector<16x128xf32>
    %239 = arith.addf %238, %219 : vector<16x128xf32>
    %240 = arith.addf %225, %231 : vector<16x128xf32>
    %241 = arith.addf %240, %237 : vector<16x128xf32>
    %242 = arith.addf %239, %241 : vector<16x128xf32>
    %243 = vector.extract_strided_slice %242 {offsets = [0, 0], sizes = [16, 96], strides = [1, 1]} : vector<16x128xf32> to vector<16x96xf32>
    %244 = arith.negf %243 : vector<16x96xf32>
    %245 = math.exp %244 : vector<16x96xf32>
    %cst = arith.constant 1.000000e+00 : f32
    %246 = vector.broadcast %cst : f32 to vector<16x96xf32>
    %247 = arith.addf %246, %245 : vector<16x96xf32>
    %248 = arith.divf %246, %247 : vector<16x96xf32>
    %249 = vector.extract_strided_slice %248 {offsets = [0, 0], sizes = [16, 32], strides = [1, 1]} : vector<16x96xf32> to vector<16x32xf32>
    %250 = vector.extract_strided_slice %248 {offsets = [0, 32], sizes = [16, 32], strides = [1, 1]} : vector<16x96xf32> to vector<16x32xf32>
    %251 = vector.extract_strided_slice %248 {offsets = [0, 64], sizes = [16, 32], strides = [1, 1]} : vector<16x96xf32> to vector<16x32xf32>
    %252 = vector.extract_strided_slice %242 {offsets = [0, 96], sizes = [16, 32], strides = [1, 1]} : vector<16x128xf32> to vector<16x32xf32>
    %253 = math.tanh %252 : vector<16x32xf32>
    %c0_85 = arith.constant 0 : index
    %c0_86 = arith.constant 0 : index
    %c0_87 = arith.constant 0 : index
    %254 = vector.load %arg2[%c0_85, %c0_86, %c0_87] : memref<1x1x32xf32, #tpu.memory_space<vmem>>, vector<1x1x32xf32>
    %255 = vector.shape_cast %254 : vector<1x1x32xf32> to vector<1x32xf32>
    %256 = vector.broadcast %255 : vector<1x32xf32> to vector<16x32xf32>
    %257 = arith.mulf %250, %256 : vector<16x32xf32>
    %258 = arith.mulf %249, %253 : vector<16x32xf32>
    %259 = arith.addf %257, %258 : vector<16x32xf32>
    %260 = math.tanh %259 : vector<16x32xf32>
    %261 = arith.mulf %251, %260 : vector<16x32xf32>
    %262 = vector.extract_strided_slice %261 {offsets = [0, 0], sizes = [4, 32], strides = [1, 1]} : vector<16x32xf32> to vector<4x32xf32>
    %263 = vector.extract_strided_slice %261 {offsets = [4, 0], sizes = [4, 32], strides = [1, 1]} : vector<16x32xf32> to vector<4x32xf32>
    %264 = arith.addf %262, %263 : vector<4x32xf32>
    %265 = vector.extract_strided_slice %261 {offsets = [8, 0], sizes = [4, 32], strides = [1, 1]} : vector<16x32xf32> to vector<4x32xf32>
    %266 = arith.addf %264, %265 : vector<4x32xf32>
    %267 = vector.extract_strided_slice %261 {offsets = [12, 0], sizes = [4, 32], strides = [1, 1]} : vector<16x32xf32> to vector<4x32xf32>
    %268 = tpu.concatenate %267, %266 in 0 : vector<4x32xf32>, vector<4x32xf32> -> vector<8x32xf32>
    %c0_88 = arith.constant 0 : index
    %c0_89 = arith.constant 0 : index
    %c0_90 = arith.constant 0 : index
    %269 = vector.load %arg5[%c0_88, %c0_89, %c0_90] : memref<32x8x128xf32, #tpu.memory_space<vmem>>, vector<1x8x128xf32>
    %270 = vector.shape_cast %269 : vector<1x8x128xf32> to vector<8x128xf32>
    %271 = vector.extract_strided_slice %268 {offsets = [0, 0], sizes = [8, 1], strides = [1, 1]} : vector<8x32xf32> to vector<8x1xf32>
    %272 = vector.broadcast %271 : vector<8x1xf32> to vector<8x128xf32>
    %273 = arith.mulf %270, %272 : vector<8x128xf32>
    %c1_91 = arith.constant 1 : index
    %c0_92 = arith.constant 0 : index
    %c0_93 = arith.constant 0 : index
    %274 = vector.load %arg5[%c1_91, %c0_92, %c0_93] : memref<32x8x128xf32, #tpu.memory_space<vmem>>, vector<1x8x128xf32>
    %275 = vector.shape_cast %274 : vector<1x8x128xf32> to vector<8x128xf32>
    %276 = vector.extract_strided_slice %268 {offsets = [0, 1], sizes = [8, 1], strides = [1, 1]} : vector<8x32xf32> to vector<8x1xf32>
    %277 = vector.broadcast %276 : vector<8x1xf32> to vector<8x128xf32>
    %278 = arith.mulf %275, %277 : vector<8x128xf32>
    %c2_94 = arith.constant 2 : index
    %c0_95 = arith.constant 0 : index
    %c0_96 = arith.constant 0 : index
    %279 = vector.load %arg5[%c2_94, %c0_95, %c0_96] : memref<32x8x128xf32, #tpu.memory_space<vmem>>, vector<1x8x128xf32>
    %280 = vector.shape_cast %279 : vector<1x8x128xf32> to vector<8x128xf32>
    %281 = vector.extract_strided_slice %268 {offsets = [0, 2], sizes = [8, 1], strides = [1, 1]} : vector<8x32xf32> to vector<8x1xf32>
    %282 = vector.broadcast %281 : vector<8x1xf32> to vector<8x128xf32>
    %283 = arith.mulf %280, %282 : vector<8x128xf32>
    %c3_97 = arith.constant 3 : index
    %c0_98 = arith.constant 0 : index
    %c0_99 = arith.constant 0 : index
    %284 = vector.load %arg5[%c3_97, %c0_98, %c0_99] : memref<32x8x128xf32, #tpu.memory_space<vmem>>, vector<1x8x128xf32>
    %285 = vector.shape_cast %284 : vector<1x8x128xf32> to vector<8x128xf32>
    %286 = vector.extract_strided_slice %268 {offsets = [0, 3], sizes = [8, 1], strides = [1, 1]} : vector<8x32xf32> to vector<8x1xf32>
    %287 = vector.broadcast %286 : vector<8x1xf32> to vector<8x128xf32>
    %288 = arith.mulf %285, %287 : vector<8x128xf32>
    %c4_100 = arith.constant 4 : index
    %c0_101 = arith.constant 0 : index
    %c0_102 = arith.constant 0 : index
    %289 = vector.load %arg5[%c4_100, %c0_101, %c0_102] : memref<32x8x128xf32, #tpu.memory_space<vmem>>, vector<1x8x128xf32>
    %290 = vector.shape_cast %289 : vector<1x8x128xf32> to vector<8x128xf32>
    %291 = vector.extract_strided_slice %268 {offsets = [0, 4], sizes = [8, 1], strides = [1, 1]} : vector<8x32xf32> to vector<8x1xf32>
    %292 = vector.broadcast %291 : vector<8x1xf32> to vector<8x128xf32>
    %293 = arith.mulf %290, %292 : vector<8x128xf32>
    %294 = arith.addf %273, %293 : vector<8x128xf32>
    %c5_103 = arith.constant 5 : index
    %c0_104 = arith.constant 0 : index
    %c0_105 = arith.constant 0 : index
    %295 = vector.load %arg5[%c5_103, %c0_104, %c0_105] : memref<32x8x128xf32, #tpu.memory_space<vmem>>, vector<1x8x128xf32>
    %296 = vector.shape_cast %295 : vector<1x8x128xf32> to vector<8x128xf32>
    %297 = vector.extract_strided_slice %268 {offsets = [0, 5], sizes = [8, 1], strides = [1, 1]} : vector<8x32xf32> to vector<8x1xf32>
    %298 = vector.broadcast %297 : vector<8x1xf32> to vector<8x128xf32>
    %299 = arith.mulf %296, %298 : vector<8x128xf32>
    %300 = arith.addf %278, %299 : vector<8x128xf32>
    %c6_106 = arith.constant 6 : index
    %c0_107 = arith.constant 0 : index
    %c0_108 = arith.constant 0 : index
    %301 = vector.load %arg5[%c6_106, %c0_107, %c0_108] : memref<32x8x128xf32, #tpu.memory_space<vmem>>, vector<1x8x128xf32>
    %302 = vector.shape_cast %301 : vector<1x8x128xf32> to vector<8x128xf32>
    %303 = vector.extract_strided_slice %268 {offsets = [0, 6], sizes = [8, 1], strides = [1, 1]} : vector<8x32xf32> to vector<8x1xf32>
    %304 = vector.broadcast %303 : vector<8x1xf32> to vector<8x128xf32>
    %305 = arith.mulf %302, %304 : vector<8x128xf32>
    %306 = arith.addf %283, %305 : vector<8x128xf32>
    %c7_109 = arith.constant 7 : index
    %c0_110 = arith.constant 0 : index
    %c0_111 = arith.constant 0 : index
    %307 = vector.load %arg5[%c7_109, %c0_110, %c0_111] : memref<32x8x128xf32, #tpu.memory_space<vmem>>, vector<1x8x128xf32>
    %308 = vector.shape_cast %307 : vector<1x8x128xf32> to vector<8x128xf32>
    %309 = vector.extract_strided_slice %268 {offsets = [0, 7], sizes = [8, 1], strides = [1, 1]} : vector<8x32xf32> to vector<8x1xf32>
    %310 = vector.broadcast %309 : vector<8x1xf32> to vector<8x128xf32>
    %311 = arith.mulf %308, %310 : vector<8x128xf32>
    %312 = arith.addf %288, %311 : vector<8x128xf32>
    %c8_112 = arith.constant 8 : index
    %c0_113 = arith.constant 0 : index
    %c0_114 = arith.constant 0 : index
    %313 = vector.load %arg5[%c8_112, %c0_113, %c0_114] : memref<32x8x128xf32, #tpu.memory_space<vmem>>, vector<1x8x128xf32>
    %314 = vector.shape_cast %313 : vector<1x8x128xf32> to vector<8x128xf32>
    %315 = vector.extract_strided_slice %268 {offsets = [0, 8], sizes = [8, 1], strides = [1, 1]} : vector<8x32xf32> to vector<8x1xf32>
    %316 = vector.broadcast %315 : vector<8x1xf32> to vector<8x128xf32>
    %317 = arith.mulf %314, %316 : vector<8x128xf32>
    %318 = arith.addf %294, %317 : vector<8x128xf32>
    %c9_115 = arith.constant 9 : index
    %c0_116 = arith.constant 0 : index
    %c0_117 = arith.constant 0 : index
    %319 = vector.load %arg5[%c9_115, %c0_116, %c0_117] : memref<32x8x128xf32, #tpu.memory_space<vmem>>, vector<1x8x128xf32>
    %320 = vector.shape_cast %319 : vector<1x8x128xf32> to vector<8x128xf32>
    %321 = vector.extract_strided_slice %268 {offsets = [0, 9], sizes = [8, 1], strides = [1, 1]} : vector<8x32xf32> to vector<8x1xf32>
    %322 = vector.broadcast %321 : vector<8x1xf32> to vector<8x128xf32>
    %323 = arith.mulf %320, %322 : vector<8x128xf32>
    %324 = arith.addf %300, %323 : vector<8x128xf32>
    %c10_118 = arith.constant 10 : index
    %c0_119 = arith.constant 0 : index
    %c0_120 = arith.constant 0 : index
    %325 = vector.load %arg5[%c10_118, %c0_119, %c0_120] : memref<32x8x128xf32, #tpu.memory_space<vmem>>, vector<1x8x128xf32>
    %326 = vector.shape_cast %325 : vector<1x8x128xf32> to vector<8x128xf32>
    %327 = vector.extract_strided_slice %268 {offsets = [0, 10], sizes = [8, 1], strides = [1, 1]} : vector<8x32xf32> to vector<8x1xf32>
    %328 = vector.broadcast %327 : vector<8x1xf32> to vector<8x128xf32>
    %329 = arith.mulf %326, %328 : vector<8x128xf32>
    %330 = arith.addf %306, %329 : vector<8x128xf32>
    %c11_121 = arith.constant 11 : index
    %c0_122 = arith.constant 0 : index
    %c0_123 = arith.constant 0 : index
    %331 = vector.load %arg5[%c11_121, %c0_122, %c0_123] : memref<32x8x128xf32, #tpu.memory_space<vmem>>, vector<1x8x128xf32>
    %332 = vector.shape_cast %331 : vector<1x8x128xf32> to vector<8x128xf32>
    %333 = vector.extract_strided_slice %268 {offsets = [0, 11], sizes = [8, 1], strides = [1, 1]} : vector<8x32xf32> to vector<8x1xf32>
    %334 = vector.broadcast %333 : vector<8x1xf32> to vector<8x128xf32>
    %335 = arith.mulf %332, %334 : vector<8x128xf32>
    %336 = arith.addf %312, %335 : vector<8x128xf32>
    %c12_124 = arith.constant 12 : index
    %c0_125 = arith.constant 0 : index
    %c0_126 = arith.constant 0 : index
    %337 = vector.load %arg5[%c12_124, %c0_125, %c0_126] : memref<32x8x128xf32, #tpu.memory_space<vmem>>, vector<1x8x128xf32>
    %338 = vector.shape_cast %337 : vector<1x8x128xf32> to vector<8x128xf32>
    %339 = vector.extract_strided_slice %268 {offsets = [0, 12], sizes = [8, 1], strides = [1, 1]} : vector<8x32xf32> to vector<8x1xf32>
    %340 = vector.broadcast %339 : vector<8x1xf32> to vector<8x128xf32>
    %341 = arith.mulf %338, %340 : vector<8x128xf32>
    %342 = arith.addf %318, %341 : vector<8x128xf32>
    %c13_127 = arith.constant 13 : index
    %c0_128 = arith.constant 0 : index
    %c0_129 = arith.constant 0 : index
    %343 = vector.load %arg5[%c13_127, %c0_128, %c0_129] : memref<32x8x128xf32, #tpu.memory_space<vmem>>, vector<1x8x128xf32>
    %344 = vector.shape_cast %343 : vector<1x8x128xf32> to vector<8x128xf32>
    %345 = vector.extract_strided_slice %268 {offsets = [0, 13], sizes = [8, 1], strides = [1, 1]} : vector<8x32xf32> to vector<8x1xf32>
    %346 = vector.broadcast %345 : vector<8x1xf32> to vector<8x128xf32>
    %347 = arith.mulf %344, %346 : vector<8x128xf32>
    %348 = arith.addf %324, %347 : vector<8x128xf32>
    %c14_130 = arith.constant 14 : index
    %c0_131 = arith.constant 0 : index
    %c0_132 = arith.constant 0 : index
    %349 = vector.load %arg5[%c14_130, %c0_131, %c0_132] : memref<32x8x128xf32, #tpu.memory_space<vmem>>, vector<1x8x128xf32>
    %350 = vector.shape_cast %349 : vector<1x8x128xf32> to vector<8x128xf32>
    %351 = vector.extract_strided_slice %268 {offsets = [0, 14], sizes = [8, 1], strides = [1, 1]} : vector<8x32xf32> to vector<8x1xf32>
    %352 = vector.broadcast %351 : vector<8x1xf32> to vector<8x128xf32>
    %353 = arith.mulf %350, %352 : vector<8x128xf32>
    %354 = arith.addf %330, %353 : vector<8x128xf32>
    %c15_133 = arith.constant 15 : index
    %c0_134 = arith.constant 0 : index
    %c0_135 = arith.constant 0 : index
    %355 = vector.load %arg5[%c15_133, %c0_134, %c0_135] : memref<32x8x128xf32, #tpu.memory_space<vmem>>, vector<1x8x128xf32>
    %356 = vector.shape_cast %355 : vector<1x8x128xf32> to vector<8x128xf32>
    %357 = vector.extract_strided_slice %268 {offsets = [0, 15], sizes = [8, 1], strides = [1, 1]} : vector<8x32xf32> to vector<8x1xf32>
    %358 = vector.broadcast %357 : vector<8x1xf32> to vector<8x128xf32>
    %359 = arith.mulf %356, %358 : vector<8x128xf32>
    %360 = arith.addf %336, %359 : vector<8x128xf32>
    %c16_136 = arith.constant 16 : index
    %c0_137 = arith.constant 0 : index
    %c0_138 = arith.constant 0 : index
    %361 = vector.load %arg5[%c16_136, %c0_137, %c0_138] : memref<32x8x128xf32, #tpu.memory_space<vmem>>, vector<1x8x128xf32>
    %362 = vector.shape_cast %361 : vector<1x8x128xf32> to vector<8x128xf32>
    %363 = vector.extract_strided_slice %268 {offsets = [0, 16], sizes = [8, 1], strides = [1, 1]} : vector<8x32xf32> to vector<8x1xf32>
    %364 = vector.broadcast %363 : vector<8x1xf32> to vector<8x128xf32>
    %365 = arith.mulf %362, %364 : vector<8x128xf32>
    %366 = arith.addf %342, %365 : vector<8x128xf32>
    %c17_139 = arith.constant 17 : index
    %c0_140 = arith.constant 0 : index
    %c0_141 = arith.constant 0 : index
    %367 = vector.load %arg5[%c17_139, %c0_140, %c0_141] : memref<32x8x128xf32, #tpu.memory_space<vmem>>, vector<1x8x128xf32>
    %368 = vector.shape_cast %367 : vector<1x8x128xf32> to vector<8x128xf32>
    %369 = vector.extract_strided_slice %268 {offsets = [0, 17], sizes = [8, 1], strides = [1, 1]} : vector<8x32xf32> to vector<8x1xf32>
    %370 = vector.broadcast %369 : vector<8x1xf32> to vector<8x128xf32>
    %371 = arith.mulf %368, %370 : vector<8x128xf32>
    %372 = arith.addf %348, %371 : vector<8x128xf32>
    %c18_142 = arith.constant 18 : index
    %c0_143 = arith.constant 0 : index
    %c0_144 = arith.constant 0 : index
    %373 = vector.load %arg5[%c18_142, %c0_143, %c0_144] : memref<32x8x128xf32, #tpu.memory_space<vmem>>, vector<1x8x128xf32>
    %374 = vector.shape_cast %373 : vector<1x8x128xf32> to vector<8x128xf32>
    %375 = vector.extract_strided_slice %268 {offsets = [0, 18], sizes = [8, 1], strides = [1, 1]} : vector<8x32xf32> to vector<8x1xf32>
    %376 = vector.broadcast %375 : vector<8x1xf32> to vector<8x128xf32>
    %377 = arith.mulf %374, %376 : vector<8x128xf32>
    %378 = arith.addf %354, %377 : vector<8x128xf32>
    %c19_145 = arith.constant 19 : index
    %c0_146 = arith.constant 0 : index
    %c0_147 = arith.constant 0 : index
    %379 = vector.load %arg5[%c19_145, %c0_146, %c0_147] : memref<32x8x128xf32, #tpu.memory_space<vmem>>, vector<1x8x128xf32>
    %380 = vector.shape_cast %379 : vector<1x8x128xf32> to vector<8x128xf32>
    %381 = vector.extract_strided_slice %268 {offsets = [0, 19], sizes = [8, 1], strides = [1, 1]} : vector<8x32xf32> to vector<8x1xf32>
    %382 = vector.broadcast %381 : vector<8x1xf32> to vector<8x128xf32>
    %383 = arith.mulf %380, %382 : vector<8x128xf32>
    %384 = arith.addf %360, %383 : vector<8x128xf32>
    %c20_148 = arith.constant 20 : index
    %c0_149 = arith.constant 0 : index
    %c0_150 = arith.constant 0 : index
    %385 = vector.load %arg5[%c20_148, %c0_149, %c0_150] : memref<32x8x128xf32, #tpu.memory_space<vmem>>, vector<1x8x128xf32>
    %386 = vector.shape_cast %385 : vector<1x8x128xf32> to vector<8x128xf32>
    %387 = vector.extract_strided_slice %268 {offsets = [0, 20], sizes = [8, 1], strides = [1, 1]} : vector<8x32xf32> to vector<8x1xf32>
    %388 = vector.broadcast %387 : vector<8x1xf32> to vector<8x128xf32>
    %389 = arith.mulf %386, %388 : vector<8x128xf32>
    %390 = arith.addf %366, %389 : vector<8x128xf32>
    %c21_151 = arith.constant 21 : index
    %c0_152 = arith.constant 0 : index
    %c0_153 = arith.constant 0 : index
    %391 = vector.load %arg5[%c21_151, %c0_152, %c0_153] : memref<32x8x128xf32, #tpu.memory_space<vmem>>, vector<1x8x128xf32>
    %392 = vector.shape_cast %391 : vector<1x8x128xf32> to vector<8x128xf32>
    %393 = vector.extract_strided_slice %268 {offsets = [0, 21], sizes = [8, 1], strides = [1, 1]} : vector<8x32xf32> to vector<8x1xf32>
    %394 = vector.broadcast %393 : vector<8x1xf32> to vector<8x128xf32>
    %395 = arith.mulf %392, %394 : vector<8x128xf32>
    %396 = arith.addf %372, %395 : vector<8x128xf32>
    %c22_154 = arith.constant 22 : index
    %c0_155 = arith.constant 0 : index
    %c0_156 = arith.constant 0 : index
    %397 = vector.load %arg5[%c22_154, %c0_155, %c0_156] : memref<32x8x128xf32, #tpu.memory_space<vmem>>, vector<1x8x128xf32>
    %398 = vector.shape_cast %397 : vector<1x8x128xf32> to vector<8x128xf32>
    %399 = vector.extract_strided_slice %268 {offsets = [0, 22], sizes = [8, 1], strides = [1, 1]} : vector<8x32xf32> to vector<8x1xf32>
    %400 = vector.broadcast %399 : vector<8x1xf32> to vector<8x128xf32>
    %401 = arith.mulf %398, %400 : vector<8x128xf32>
    %402 = arith.addf %378, %401 : vector<8x128xf32>
    %c23_157 = arith.constant 23 : index
    %c0_158 = arith.constant 0 : index
    %c0_159 = arith.constant 0 : index
    %403 = vector.load %arg5[%c23_157, %c0_158, %c0_159] : memref<32x8x128xf32, #tpu.memory_space<vmem>>, vector<1x8x128xf32>
    %404 = vector.shape_cast %403 : vector<1x8x128xf32> to vector<8x128xf32>
    %405 = vector.extract_strided_slice %268 {offsets = [0, 23], sizes = [8, 1], strides = [1, 1]} : vector<8x32xf32> to vector<8x1xf32>
    %406 = vector.broadcast %405 : vector<8x1xf32> to vector<8x128xf32>
    %407 = arith.mulf %404, %406 : vector<8x128xf32>
    %408 = arith.addf %384, %407 : vector<8x128xf32>
    %c24_160 = arith.constant 24 : index
    %c0_161 = arith.constant 0 : index
    %c0_162 = arith.constant 0 : index
    %409 = vector.load %arg5[%c24_160, %c0_161, %c0_162] : memref<32x8x128xf32, #tpu.memory_space<vmem>>, vector<1x8x128xf32>
    %410 = vector.shape_cast %409 : vector<1x8x128xf32> to vector<8x128xf32>
    %411 = vector.extract_strided_slice %268 {offsets = [0, 24], sizes = [8, 1], strides = [1, 1]} : vector<8x32xf32> to vector<8x1xf32>
    %412 = vector.broadcast %411 : vector<8x1xf32> to vector<8x128xf32>
    %413 = arith.mulf %410, %412 : vector<8x128xf32>
    %414 = arith.addf %390, %413 : vector<8x128xf32>
    %c25_163 = arith.constant 25 : index
    %c0_164 = arith.constant 0 : index
    %c0_165 = arith.constant 0 : index
    %415 = vector.load %arg5[%c25_163, %c0_164, %c0_165] : memref<32x8x128xf32, #tpu.memory_space<vmem>>, vector<1x8x128xf32>
    %416 = vector.shape_cast %415 : vector<1x8x128xf32> to vector<8x128xf32>
    %417 = vector.extract_strided_slice %268 {offsets = [0, 25], sizes = [8, 1], strides = [1, 1]} : vector<8x32xf32> to vector<8x1xf32>
    %418 = vector.broadcast %417 : vector<8x1xf32> to vector<8x128xf32>
    %419 = arith.mulf %416, %418 : vector<8x128xf32>
    %420 = arith.addf %396, %419 : vector<8x128xf32>
    %c26_166 = arith.constant 26 : index
    %c0_167 = arith.constant 0 : index
    %c0_168 = arith.constant 0 : index
    %421 = vector.load %arg5[%c26_166, %c0_167, %c0_168] : memref<32x8x128xf32, #tpu.memory_space<vmem>>, vector<1x8x128xf32>
    %422 = vector.shape_cast %421 : vector<1x8x128xf32> to vector<8x128xf32>
    %423 = vector.extract_strided_slice %268 {offsets = [0, 26], sizes = [8, 1], strides = [1, 1]} : vector<8x32xf32> to vector<8x1xf32>
    %424 = vector.broadcast %423 : vector<8x1xf32> to vector<8x128xf32>
    %425 = arith.mulf %422, %424 : vector<8x128xf32>
    %426 = arith.addf %402, %425 : vector<8x128xf32>
    %c27_169 = arith.constant 27 : index
    %c0_170 = arith.constant 0 : index
    %c0_171 = arith.constant 0 : index
    %427 = vector.load %arg5[%c27_169, %c0_170, %c0_171] : memref<32x8x128xf32, #tpu.memory_space<vmem>>, vector<1x8x128xf32>
    %428 = vector.shape_cast %427 : vector<1x8x128xf32> to vector<8x128xf32>
    %429 = vector.extract_strided_slice %268 {offsets = [0, 27], sizes = [8, 1], strides = [1, 1]} : vector<8x32xf32> to vector<8x1xf32>
    %430 = vector.broadcast %429 : vector<8x1xf32> to vector<8x128xf32>
    %431 = arith.mulf %428, %430 : vector<8x128xf32>
    %432 = arith.addf %408, %431 : vector<8x128xf32>
    %c28_172 = arith.constant 28 : index
    %c0_173 = arith.constant 0 : index
    %c0_174 = arith.constant 0 : index
    %433 = vector.load %arg5[%c28_172, %c0_173, %c0_174] : memref<32x8x128xf32, #tpu.memory_space<vmem>>, vector<1x8x128xf32>
    %434 = vector.shape_cast %433 : vector<1x8x128xf32> to vector<8x128xf32>
    %435 = vector.extract_strided_slice %268 {offsets = [0, 28], sizes = [8, 1], strides = [1, 1]} : vector<8x32xf32> to vector<8x1xf32>
    %436 = vector.broadcast %435 : vector<8x1xf32> to vector<8x128xf32>
    %437 = arith.mulf %434, %436 : vector<8x128xf32>
    %438 = arith.addf %414, %437 : vector<8x128xf32>
    %c29_175 = arith.constant 29 : index
    %c0_176 = arith.constant 0 : index
    %c0_177 = arith.constant 0 : index
    %439 = vector.load %arg5[%c29_175, %c0_176, %c0_177] : memref<32x8x128xf32, #tpu.memory_space<vmem>>, vector<1x8x128xf32>
    %440 = vector.shape_cast %439 : vector<1x8x128xf32> to vector<8x128xf32>
    %441 = vector.extract_strided_slice %268 {offsets = [0, 29], sizes = [8, 1], strides = [1, 1]} : vector<8x32xf32> to vector<8x1xf32>
    %442 = vector.broadcast %441 : vector<8x1xf32> to vector<8x128xf32>
    %443 = arith.mulf %440, %442 : vector<8x128xf32>
    %444 = arith.addf %420, %443 : vector<8x128xf32>
    %c30_178 = arith.constant 30 : index
    %c0_179 = arith.constant 0 : index
    %c0_180 = arith.constant 0 : index
    %445 = vector.load %arg5[%c30_178, %c0_179, %c0_180] : memref<32x8x128xf32, #tpu.memory_space<vmem>>, vector<1x8x128xf32>
    %446 = vector.shape_cast %445 : vector<1x8x128xf32> to vector<8x128xf32>
    %447 = vector.extract_strided_slice %268 {offsets = [0, 30], sizes = [8, 1], strides = [1, 1]} : vector<8x32xf32> to vector<8x1xf32>
    %448 = vector.broadcast %447 : vector<8x1xf32> to vector<8x128xf32>
    %449 = arith.mulf %446, %448 : vector<8x128xf32>
    %450 = arith.addf %426, %449 : vector<8x128xf32>
    %c31_181 = arith.constant 31 : index
    %c0_182 = arith.constant 0 : index
    %c0_183 = arith.constant 0 : index
    %451 = vector.load %arg5[%c31_181, %c0_182, %c0_183] : memref<32x8x128xf32, #tpu.memory_space<vmem>>, vector<1x8x128xf32>
    %452 = vector.shape_cast %451 : vector<1x8x128xf32> to vector<8x128xf32>
    %453 = vector.extract_strided_slice %268 {offsets = [0, 31], sizes = [8, 1], strides = [1, 1]} : vector<8x32xf32> to vector<8x1xf32>
    %454 = vector.broadcast %453 : vector<8x1xf32> to vector<8x128xf32>
    %455 = arith.mulf %452, %454 : vector<8x128xf32>
    %456 = arith.addf %432, %455 : vector<8x128xf32>
    %457 = arith.addf %438, %444 : vector<8x128xf32>
    %458 = arith.addf %450, %456 : vector<8x128xf32>
    %459 = arith.addf %457, %458 : vector<8x128xf32>
    %460 = vector.extract_strided_slice %459 {offsets = [0, 0], sizes = [4, 128], strides = [1, 1]} : vector<8x128xf32> to vector<4x128xf32>
    %461 = vector.extract_strided_slice %459 {offsets = [4, 0], sizes = [4, 128], strides = [1, 1]} : vector<8x128xf32> to vector<4x128xf32>
    %462 = arith.addf %460, %461 : vector<4x128xf32>
    %cst_184 = arith.constant dense<0.000000e+00> : vector<4xf32>
    %463 = vector.multi_reduction <add>, %462, %cst_184 [1] : vector<4x128xf32> to vector<4xf32>
    %464 = vector.shape_cast %463 : vector<4xf32> to vector<4x1xf32>
    %cst_185 = arith.constant 1.280000e+02 : f32
    %465 = vector.broadcast %cst_185 : f32 to vector<4x1xf32>
    %466 = arith.divf %464, %465 : vector<4x1xf32>
    %467 = vector.broadcast %466 : vector<4x1xf32> to vector<4x128xf32>
    %468 = arith.subf %462, %467 : vector<4x128xf32>
    %469 = arith.mulf %468, %468 : vector<4x128xf32>
    %cst_186 = arith.constant dense<0.000000e+00> : vector<4xf32>
    %470 = vector.multi_reduction <add>, %469, %cst_186 [1] : vector<4x128xf32> to vector<4xf32>
    %471 = vector.shape_cast %470 : vector<4xf32> to vector<4x1xf32>
    %cst_187 = arith.constant 1.280000e+02 : f32
    %472 = vector.broadcast %cst_187 : f32 to vector<4x1xf32>
    %473 = arith.divf %471, %472 : vector<4x1xf32>
    %474 = vector.broadcast %466 : vector<4x1xf32> to vector<4x128xf32>
    %475 = arith.subf %462, %474 : vector<4x128xf32>
    %cst_188 = arith.constant 9.99999974E-6 : f32
    %476 = vector.broadcast %cst_188 : f32 to vector<4x1xf32>
    %477 = arith.addf %473, %476 : vector<4x1xf32>
    %478 = math.rsqrt %477 : vector<4x1xf32>
    %479 = vector.broadcast %478 : vector<4x1xf32> to vector<4x128xf32>
    %480 = arith.mulf %475, %479 : vector<4x128xf32>
    %c0_189 = arith.constant 0 : index
    %c0_190 = arith.constant 0 : index
    %481 = vector.load %arg6[%c0_189, %c0_190] : memref<4x128xf32, #tpu.memory_space<vmem>>, vector<4x128xf32>
    %482 = arith.mulf %480, %481 : vector<4x128xf32>
    %c0_191 = arith.constant 0 : index
    %c0_192 = arith.constant 0 : index
    %483 = vector.load %arg7[%c0_191, %c0_192] : memref<4x128xf32, #tpu.memory_space<vmem>>, vector<4x128xf32>
    %484 = arith.addf %482, %483 : vector<4x128xf32>
    %cst_193 = arith.constant 0.000000e+00 : f32
    %485 = vector.broadcast %cst_193 : f32 to vector<4x128xf32>
    %486 = arith.maximumf %484, %485 : vector<4x128xf32>
    %c0_194 = arith.constant 0 : index
    %c0_195 = arith.constant 0 : index
    %487 = vector.load %arg8[%c0_194, %c0_195] : memref<4x128xf32, #tpu.memory_space<vmem>>, vector<4x128xf32>
    %488 = arith.mulf %486, %487 : vector<4x128xf32>
    %cst_196 = arith.constant dense<0.000000e+00> : vector<4xf32>
    %489 = vector.multi_reduction <add>, %488, %cst_196 [1] : vector<4x128xf32> to vector<4xf32>
    %490 = vector.shape_cast %489 : vector<4xf32> to vector<4x1xf32>
    %c0_197 = arith.constant 0 : index
    %c0_198 = arith.constant 0 : index
    %c0_199 = arith.constant 0 : index
    %491 = vector.load %arg9[%c0_197, %c0_198, %c0_199] : memref<1x4x1xf32, #tpu.memory_space<vmem>>, vector<1x4x1xf32>
    %492 = vector.shape_cast %491 : vector<1x4x1xf32> to vector<4x1xf32>
    %493 = vector.shape_cast %490 : vector<4x1xf32> to vector<1x4x1xf32>
    tpu.vector_store %arg9[%c0_197, %c0_198, %c0_199], %493 {strides = array<i32>} : memref<1x4x1xf32, #tpu.memory_space<vmem>>, vector<1x4x1xf32>,
    return
  }
  func.func @transform_0(%arg0: i32) -> (i32, i32, i32) {
    %c0_i32 = arith.constant 0 : i32
    %c0_i32_0 = arith.constant 0 : i32
    %c0_i32_1 = arith.constant 0 : i32
    return %arg0, %c0_i32, %c0_i32_0 : i32, i32, i32
  }
  func.func @transform_1(%arg0: i32) -> (i32, i32, i32) {
    %c0_i32 = arith.constant 0 : i32
    %c0_i32_0 = arith.constant 0 : i32
    %c0_i32_1 = arith.constant 0 : i32
    return %arg0, %c0_i32, %c0_i32_0 : i32, i32, i32
  }
  func.func @transform_2(%arg0: i32) -> (i32, i32, i32) {
    %c0_i32 = arith.constant 0 : i32
    %c0_i32_0 = arith.constant 0 : i32
    %c0_i32_1 = arith.constant 0 : i32
    %c0_i32_2 = arith.constant 0 : i32
    return %c0_i32, %c0_i32_0, %c0_i32_1 : i32, i32, i32
  }
  func.func @transform_3(%arg0: i32) -> (i32, i32) {
    %c0_i32 = arith.constant 0 : i32
    %c0_i32_0 = arith.constant 0 : i32
    %c0_i32_1 = arith.constant 0 : i32
    return %c0_i32, %c0_i32_0 : i32, i32
  }
  func.func @transform_4(%arg0: i32) -> (i32, i32, i32) {
    %c0_i32 = arith.constant 0 : i32
    %c0_i32_0 = arith.constant 0 : i32
    %c0_i32_1 = arith.constant 0 : i32
    %c0_i32_2 = arith.constant 0 : i32
    return %c0_i32, %c0_i32_0, %c0_i32_1 : i32, i32, i32
  }
  func.func @transform_5(%arg0: i32) -> (i32, i32) {
    %c0_i32 = arith.constant 0 : i32
    %c0_i32_0 = arith.constant 0 : i32
    %c0_i32_1 = arith.constant 0 : i32
    return %c0_i32, %c0_i32_0 : i32, i32
  }
  func.func @transform_6(%arg0: i32) -> (i32, i32) {
    %c0_i32 = arith.constant 0 : i32
    %c0_i32_0 = arith.constant 0 : i32
    %c0_i32_1 = arith.constant 0 : i32
    return %c0_i32, %c0_i32_0 : i32, i32
  }
  func.func @transform_7(%arg0: i32) -> (i32, i32) {
    %c0_i32 = arith.constant 0 : i32
    %c0_i32_0 = arith.constant 0 : i32
    %c0_i32_1 = arith.constant 0 : i32
    return %c0_i32, %c0_i32_0 : i32, i32
  }
  func.func @transform_8(%arg0: i32) -> (i32, i32, i32) {
    %c0_i32 = arith.constant 0 : i32
    %c0_i32_0 = arith.constant 0 : i32
    %c0_i32_1 = arith.constant 0 : i32
    return %arg0, %c0_i32, %c0_i32_0 : i32, i32, i32
  }
}

</mosaic_0001>

<bundles_post_ra>
// kernel: umpnn_forward_batched.1
= control target key start
LH: loop header
LB: loop body
LE: loop exit
PB: predicated region body
PF: predicated region fallthrough
CT: control target
= control target key end

     0   :  { %s1792_s27 = smov 0   ;;  %s2488_s0 = inlined_call_operand.vmem [shape: f32[8,16,40], index: 0, kind: input, shape index: {}]   ;;  %s2489_s1 = inlined_call_operand.vmem [shape: f32[8,1,32], index: 1, kind: input, shape index: {}]   ;;  %s2490_s2 = inlined_call_operand.vmem [shape: f32[40,16,128], index: 2, kind: input, shape index: {}]   ;;  %s2491_s3 = inlined_call_operand.vmem [shape: f32[16,128], index: 3, kind: input, shape index: {}]   ;;  %s2492_s4 = inlined_call_operand.vmem [shape: f32[32,8,128], index: 4, kind: input, shape index: {}]   ;;  %s2493_s5 = inlined_call_operand.vmem [shape: f32[4,128], index: 5, kind: input, shape index: {}]   ;;  %s2494_s6 = inlined_call_operand.vmem [shape: f32[4,128], index: 6, kind: input, shape index: {}]   ;;  %s2495_s7 = inlined_call_operand.vmem [shape: f32[4,128], index: 7, kind: input, shape index: {}]   ;;  %s2496_s8 = inlined_call_operand.vmem [shape: f32[8,4,1], index: 8, kind: output, shape index: {}]  }
   0x1 LB: > { %s1340_s28 = sadd.s32 4294967295, %s1672_s27   ;;  %p1344_p0 = scmp.ge.s32.totalorder %s1672_s27, 1  ;;  %s1672_s27 = sphi %s1792_s27, %s18_s27  }
   0x2   : > { %p270_p1 = scmp.lt.s32.totalorder %s1672_s27, 9 }
   0x4   : > { %p271_p2 = pnand %p1344_p0, %p270_p1 }
   0x5   : > { %p306_p3 = scmp.lt.s32.totalorder (!%p271_p2), %s1340_s28, 7  ;;  %s1714_s18 = smov (!%p271_p2), 32  }
   0x6   : > { %274 = sbr.rel (%p271_p2) target bundleno = 1479 (0x5c7), region = 52 }
   0xb   : > { %v1674_v0 = vmov 5   ;;  %v1675_v1 = vmov 1   ;;  %s2498_s28 = smov (!%p306_p3, %s1340_s28), 7  ;;  %v1676_v3 = vmov 6   ;;  %v1677_v4 = vmov 3   ;;  %v1356_v33 = vld [vmem:[%s2490_s2 + $0x50] sm:$0xff] }
   0xc   : > { %1545 = vset.pattern.permute.xlu1 %v1674_v0  ;;  %1544 = vset.pattern.permute.xlu0 %v1675_v1  ;;  %s1462_s29 = sshll.u32 %s2498_s28, 4  ;;  %v1678_v5 = vmov 0   ;;  %v1679_v6 = vmov 9   ;;  %v1680_v7 = vmov 4   ;;  %v1681_v8 = vmov 2   ;;  %v1348_v34 = vld [vmem:[%s2490_s2 + $0x10] sm:$0xff]  ;;  %s313_s15 = scalar_lea.vmem %s2489_s1, %s2498_s28 }
   0xd   : > { %s310_s10 = scalar_lea.vmem %s2488_s0, %s1462_s29  ;;  %v1682_v10 = vmov 7   ;;  %v1683_v11 = vmov 8   ;;  %v1684_v12 = vmov 10   ;;  %v1685_v13 = vmov 14   ;;  %v1364_v40 = vld [vmem:[%s2490_s2 + $0x90] sm:$0xff]  ;;  %v1351_v59 = vld [vmem:[%s2490_s2 + $0x28] sm:$0xff] }
   0xe   : > { %v1806_v2 = vld [vmem:[%s310_s10] sm:$0xff]  ;;  %v1816_v9 = vld [vmem:[%s310_s10 + $0x8] sm:$0xff]  ;;  %v1686_v14 = vmov 11   ;;  %v1687_v15 = vmov 17   ;;  %v1688_v16 = vmov 13   ;;  %v1689_v17 = vmov 16  }
   0xf   : > { %392 = vperm.xlu1 %1545, %v1806_v2   ;;  %338 = vperm.xlu0 %1544, %v1806_v2   ;;  %v1690_v18 = vmov 22   ;;  %v1691_v19 = vmov 12   ;;  %v1692_v20 = vmov 23   ;;  %v1693_v21 = vmov 15   ;;  %v1359_v61 = vld [vmem:[%s2490_s2 + $0x68] sm:$0xff]  ;;  %s1347_s9 = sshll.u32 %s2498_s28, 2 }
  0x10   : > { %v1694_v22 = vmov 18   ;;  %v1695_v23 = vmov 29   ;;  %v1696_v24 = vmov 35   ;;  %v1697_v25 = vmov 28   ;;  %v1367_v62 = vld [vmem:[%s2490_s2 + $0xa8] sm:$0xff]  ;;  %s317_s12 = scalar_lea.vmem %s2496_s8, %s1347_s9 }
  0x11   : > { %v1698_v26 = vmov 19   ;;  %v1699_v27 = vmov 34   ;;  %v1700_v28 = vmov 21   ;;  %v1701_v29 = vmov 32  }
  0x12   : > { %v1702_v30 = vmov 38   ;;  %v1703_v37 = vmov 20   ;;  %v1704_v45 = vmov 25   ;;  %v1705_v49 = vmov 26  }
  0x13   : > { %1546 = vset.pattern.permute.xlu1 %v1676_v3  ;;  %1548 = vset.pattern.permute.xlu0 %v1677_v4  ;;  %v1706_v56 = vmov 24   ;;  %v1707_v60 = vmov 27   ;;  %vm991_vm0 = vcmask 1043456   ;;  %vm1276_vm1 = vcmask 3072  }
  0x14   : > { %407 = vperm.xlu1 %1546, %v1806_v2   ;;  %364 = vperm.xlu0 %1548, %v1806_v2  }
  0x18   : > { %1547 = vset.pattern.permute.xlu1 %v1678_v5  ;;  %1551 = vset.pattern.permute.xlu0 %v1679_v6 }
  0x19   : > { %324 = vperm.xlu1 %1547, %v1806_v2   ;;  %452 = vperm.xlu0 %1551, %v1806_v2  }
  0x1d   : > { %1549 = vset.pattern.permute.xlu1 %v1680_v7  ;;  %1552 = vset.pattern.permute.xlu0 %v1681_v8 }
  0x1e   : > { %377 = vperm.xlu1 %1549, %v1806_v2   ;;  %351 = vperm.xlu0 %1552, %v1806_v2  }
  0x22   : > { %1550 = vset.pattern.permute.xlu1 %v1682_v10  ;;  %355 = vperm.xlu0 %1552, %v1816_v9  }
  0x23   : > { %422 = vperm.xlu1 %1550, %v1806_v2  }
  0x26   : > { %1557 = vset.pattern.permute.xlu0 %v1683_v11 }
  0x27   : > { %1553 = vset.pattern.permute.xlu1 %v1684_v12  ;;  %437 = vperm.xlu0 %1557, %v1806_v2  }
  0x28   : > { %467 = vperm.xlu1 %1553, %v1806_v2  }
  0x2b   : > { %1560 = vset.pattern.permute.xlu0 %v1685_v13 }
  0x2c   : > { %1554 = vset.pattern.permute.xlu1 %v1675_v1  ;;  %527 = vperm.xlu0 %1560, %v1806_v2  }
  0x2d   : > { %342 = vperm.xlu1 %1554, %v1816_v9  }
  0x30   : > { %1563 = vset.pattern.permute.xlu0 %v1680_v7 }
  0x31   : > { %1555 = vset.pattern.permute.xlu1 %v1674_v0  ;;  %381 = vperm.xlu0 %1563, %v1816_v9  }
  0x32   : > { %396 = vperm.xlu1 %1555, %v1816_v9  }
  0x35   : > { %1566 = vset.pattern.permute.xlu0 %v1684_v12 }
  0x36   : > { %1556 = vset.pattern.permute.xlu1 %v1676_v3  ;;  %471 = vperm.xlu0 %1566, %v1816_v9  }
  0x37   : > { %411 = vperm.xlu1 %1556, %v1816_v9  }
  0x3a   : > { %1571 = vset.pattern.permute.xlu0 %v1686_v14 }
  0x3b   : > { %1558 = vset.pattern.permute.xlu1 %v1686_v14  ;;  %486 = vperm.xlu0 %1571, %v1816_v9  }
  0x3c   : > { %482 = vperm.xlu1 %1558, %v1806_v2  }
  0x3f   : > { %1572 = vset.pattern.permute.xlu0 %v1687_v15  ;;  %v1710_v15 = vmov 33  }
  0x40   : > { %1559 = vset.pattern.permute.xlu1 %v1688_v16  ;;  %572 = vperm.xlu0 %1572, %v1806_v2  }
  0x41   : > { %512 = vperm.xlu1 %1559, %v1806_v2  }
  0x44   : > { %576 = vperm.xlu0 %1572, %v1816_v9  }
  0x45   : > { %1561 = vset.pattern.permute.xlu1 %v1678_v5 }
  0x46   : > { %329 = vperm.xlu1 %1561, %v1816_v9  }
  0x48   : > { %1579 = vset.pattern.permute.xlu0 %v1689_v17 }
  0x49   : > { %557 = vperm.xlu0 %1579, %v1806_v2  }
  0x4a   : > { %1562 = vset.pattern.permute.xlu1 %v1677_v4  ;;  %v1708_v4 = vmov 30  }
  0x4b   : > { %368 = vperm.xlu1 %1562, %v1816_v9  }
  0x4d   : > { %561 = vperm.xlu0 %1579, %v1816_v9  }
  0x4f   : > { %1564 = vset.pattern.permute.xlu1 %v1682_v10 }
  0x50   : > { %426 = vperm.xlu1 %1564, %v1816_v9  }
  0x51   : > { %1584 = vset.pattern.permute.xlu0 %v1690_v18 }
  0x52   : > { %647 = vperm.xlu0 %1584, %v1806_v2  }
  0x54   : > { %1565 = vset.pattern.permute.xlu1 %v1679_v6 }
  0x55   : > { %456 = vperm.xlu1 %1565, %v1816_v9  }
  0x56   : > { %651 = vperm.xlu0 %1584, %v1816_v9  }
  0x59   : > { %1567 = vset.pattern.permute.xlu1 %v1691_v19 }
  0x5a   : > { %497 = vperm.xlu1 %1567, %v1806_v2   ;;  %1587 = vset.pattern.permute.xlu0 %v1692_v20 }
  0x5b   : > { %662 = vperm.xlu0 %1587, %v1806_v2  }
  0x5e   : > { %1568 = vset.pattern.permute.xlu1 %v1693_v21 }
  0x5f   : > { %542 = vperm.xlu1 %1568, %v1806_v2   ;;  %666 = vperm.xlu0 %1587, %v1816_v9  }
  0x63   : > { %1569 = vset.pattern.permute.xlu1 %v1694_v22  ;;  %1592 = vset.pattern.permute.xlu0 %v1695_v23 }
  0x64   : > { %587 = vperm.xlu1 %1569, %v1806_v2   ;;  %752 = vperm.xlu0 %1592, %v1806_v2  }
  0x68   : > { %1570 = vset.pattern.permute.xlu1 %v1683_v11  ;;  %756 = vperm.xlu0 %1592, %v1816_v9  }
  0x69   : > { %441 = vperm.xlu1 %1570, %v1816_v9  }
  0x6c   : > { %1601 = vset.pattern.permute.xlu0 %v1696_v24 }
  0x6d   : > { %1573 = vset.pattern.permute.xlu1 %v1688_v16  ;;  %842 = vperm.xlu0 %1601, %v1806_v2  }
  0x6e   : > { %516 = vperm.xlu1 %1573, %v1816_v9  }
  0x71   : > { %1602 = vset.pattern.permute.xlu0 %v1697_v25 }
  0x72   : > { %1574 = vset.pattern.permute.xlu1 %v1685_v13  ;;  %737 = vperm.xlu0 %1602, %v1806_v2   ;;  %v1709_v13 = vmov 31  }
  0x73   : > { %531 = vperm.xlu1 %1574, %v1816_v9  }
  0x76   : > { %741 = vperm.xlu0 %1602, %v1816_v9  }
  0x77   : > { %1575 = vset.pattern.permute.xlu1 %v1698_v26 }
  0x78   : > { %602 = vperm.xlu1 %1575, %v1806_v2  }
  0x7a   : > { %1605 = vset.pattern.permute.xlu0 %v1699_v27  ;;  %v1712_v27 = vmov 36  }
  0x7b   : > { %827 = vperm.xlu0 %1605, %v1806_v2  }
  0x7c   : > { %1576 = vset.pattern.permute.xlu1 %v1700_v28 }
  0x7d   : > { %632 = vperm.xlu1 %1576, %v1806_v2  }
  0x7f   : > { %831 = vperm.xlu0 %1605, %v1816_v9  }
  0x81   : > { %1577 = vset.pattern.permute.xlu1 %v1691_v19 }
  0x82   : > { %501 = vperm.xlu1 %1577, %v1816_v9  }
  0x83   : > { %1610 = vset.pattern.permute.xlu0 %v1701_v29 }
  0x84   : > { %801 = vperm.xlu0 %1610, %v1816_v9  }
  0x86   : > { %1578 = vset.pattern.permute.xlu1 %v1693_v21  ;;  %v1711_v21 = vmov 37  }
  0x87   : > { %546 = vperm.xlu1 %1578, %v1816_v9  }
  0x88   : > { %1613 = vset.pattern.permute.xlu0 %v1702_v30 }
  0x89   : > { %891 = vperm.xlu0 %1613, %v1816_v9  }
  0x8a   : > { %v393_v31 = vpop.permute.xlu1 %392  ;;  %v339_v32 = vpop.permute.xlu0 %338 }
  0x8b   : > { %1580 = vset.pattern.permute.xlu1 %v1694_v22  ;;  %v399_v38 = vmul.f32 %v1356_v33, %v393_v31  ;;  %v345_v39 = vmul.f32 %v1348_v34, %v339_v32 }
  0x8c   : > { %591 = vperm.xlu1 %1580, %v1816_v9  }
  0x8d   : > { %v401_v43 = vadd.f32 %v399_v38, %v345_v39 }
  0x8f   : > { %v1874_v35 = vpop.permute.xlu1 %407  ;;  %v1876_v36 = vpop.permute.xlu0 %364 }
  0x90   : > { %1581 = vset.pattern.permute.xlu1 %v1703_v37 }
  0x91   : > { %617 = vperm.xlu1 %1581, %v1806_v2  }
  0x94   : > { %v1882_v41 = vpop.permute.xlu1 %324  ;;  %v453_v42 = vpop.permute.xlu0 %452 }
  0x95   : > { %v459_v44 = vmul.f32 %v1364_v40, %v453_v42  ;;  %1582 = vset.pattern.permute.xlu1 %v1704_v45  ;;  %v1355_v42 = vld [vmem:[%s2490_s2 + $0x48] sm:$0xff] }
  0x96   : > { %692 = vperm.xlu1 %1582, %v1806_v2  }
  0x97   : > { %v1885_v46 = vadd.f32 %v459_v44, %v401_v43  ;;  %v1363_v44 = vld [vmem:[%s2490_s2 + $0x88] sm:$0xff] }
  0x99   : > { %v1887_v47 = vpop.permute.xlu1 %377  ;;  %v1889_v48 = vpop.permute.xlu0 %351 }
  0x9a   : > { %1583 = vset.pattern.permute.xlu1 %v1705_v49 }
  0x9b   : > { %707 = vperm.xlu1 %1583, %v1806_v2  }
  0x9d   : > { %v356_v50 = vpop.permute.xlu0 %355 }
  0x9e   : > { %v1892_v51 = vpop.permute.xlu1 %422  ;;  %v359_v63 = vmul.f32 %v1351_v59, %v356_v50 }
  0x9f   : > { %1585 = vset.pattern.permute.xlu1 %v1698_v26 }
  0xa0   : > { %606 = vperm.xlu1 %1585, %v1816_v9  }
  0xa2   : > { %v1895_v52 = vpop.permute.xlu0 %437 }
  0xa3   : > { %v1897_v53 = vpop.permute.xlu1 %467 }
  0xa4   : > { %1586 = vset.pattern.permute.xlu1 %v1700_v28 }
  0xa5   : > { %636 = vperm.xlu1 %1586, %v1816_v9  }
  0xa7   : > { %v1900_v54 = vpop.permute.xlu0 %527 }
  0xa8   : > { %v1902_v55 = vpop.permute.xlu1 %342 }
  0xa9   : > { %1588 = vset.pattern.permute.xlu1 %v1706_v56 }
  0xaa   : > { %677 = vperm.xlu1 %1588, %v1806_v2  }
  0xac   : > { %v1905_v57 = vpop.permute.xlu0 %381 }
  0xad   : > { %v1907_v58 = vpop.permute.xlu1 %396 }
  0xae   : > { %1589 = vset.pattern.permute.xlu1 %v1707_v60 }
  0xaf   : > { %722 = vperm.xlu1 %1589, %v1806_v2  }
  0xb1   : > { %v472_v0 = vpop.permute.xlu0 %471 }
  0xb2   : > { %v412_v1 = vpop.permute.xlu1 %411  ;;  %v475_v5 = vmul.f32 %v1367_v62, %v472_v0 }
  0xb3   : > { %v415_v3 = vmul.f32 %v1359_v61, %v412_v1  ;;  %1590 = vset.pattern.permute.xlu1 %v1708_v4  ;;  %v1365_v61 = vld [vmem:[%s2490_s2 + $0x98] sm:$0xff] }
  0xb4   : > { %767 = vperm.xlu1 %1590, %v1806_v2   ;;  %v1373_v1 = vld [vmem:[%s2490_s2 + $0xd8] sm:$0xff] }
  0xb5   : > { %v417_v6 = vadd.f32 %v415_v3, %v359_v63 }
  0xb7   : > { %v1920_v7 = vadd.f32 %v475_v5, %v417_v6  ;;  %v1922_v8 = vpop.permute.xlu1 %482  ;;  %v1379_v6 = vld [vmem:[%s2490_s2 + $0x108] sm:$0xff] }
  0xb8   : > { %1591 = vset.pattern.permute.xlu1 %v1703_v37 }
  0xb9   : > { %621 = vperm.xlu1 %1591, %v1816_v9  }
  0xbc   : > { %v1925_v10 = vpop.permute.xlu1 %512 }
  0xbd   : > { %1593 = vset.pattern.permute.xlu1 %v1704_v45  ;;  %v1357_v45 = vld [vmem:[%s2490_s2 + $0x58] sm:$0xff] }
  0xbe   : > { %696 = vperm.xlu1 %1593, %v1816_v9   ;;  %v400_v63 = vmul.f32 %v1357_v45, %v1907_v58 }
  0xc1   : > { %v1928_v11 = vpop.permute.xlu1 %329 }
  0xc2   : > { %1594 = vset.pattern.permute.xlu1 %v1705_v49  ;;  %v385_v49 = vmul.f32 %v1355_v42, %v1905_v57 }
  0xc3   : > { %711 = vperm.xlu1 %1594, %v1816_v9  }
  0xc6   : > { %v1931_v12 = vpop.permute.xlu1 %368 }
  0xc7   : > { %1595 = vset.pattern.permute.xlu1 %v1709_v13 }
  0xc8   : > { %782 = vperm.xlu1 %1595, %v1806_v2  }
  0xcb   : > { %v1934_v14 = vpop.permute.xlu1 %426 }
  0xcc   : > { %1596 = vset.pattern.permute.xlu1 %v1710_v15 }
  0xcd   : > { %812 = vperm.xlu1 %1596, %v1806_v2  }
  0xd0   : > { %v1937_v16 = vpop.permute.xlu1 %456 }
  0xd1   : > { %1597 = vset.pattern.permute.xlu1 %v1706_v56  ;;  %v1371_v56 = vld [vmem:[%s2490_s2 + $0xc8] sm:$0xff]  ;;  %v460_v5 = vmul.f32 %v1365_v61, %v1937_v16  ;;  %v1389_v16 = vld [vmem:[%s2490_s2 + $0x158] sm:$0xff] }
  0xd2   : > { %681 = vperm.xlu1 %1597, %v1816_v9  }
  0xd5   : > { %v1940_v17 = vpop.permute.xlu1 %497 }
  0xd6   : > { %1598 = vset.pattern.permute.xlu1 %v1707_v60  ;;  %v1349_v60 = vld [vmem:[%s2490_s2 + $0x18] sm:$0xff] }
  0xd7   : > { %726 = vperm.xlu1 %1598, %v1816_v9  }
  0xda   : > { %v1943_v18 = vpop.permute.xlu1 %542 }
  0xdb   : > { %1599 = vset.pattern.permute.xlu1 %v1708_v4  ;;  %v346_v4 = vmul.f32 %v1349_v60, %v1902_v55  ;;  %v1387_v55 = vld [vmem:[%s2490_s2 + $0x148] sm:$0xff]  ;;  %v1397_v60 = vld [vmem:[%s2490_s2 + $0x198] sm:$0xff] }
  0xdc   : > { %771 = vperm.xlu1 %1599, %v1816_v9  }
  0xdf   : > { %v1946_v19 = vpop.permute.xlu1 %587 }
  0xe0   : > { %1600 = vset.pattern.permute.xlu1 %v1701_v29  ;;  %v1713_v29 = vmov 39  }
  0xe1   : > { %797 = vperm.xlu1 %1600, %v1806_v2  }
  0xe4   : > { %v442_v20 = vpop.permute.xlu1 %441 }
  0xe5   : > { %1603 = vset.pattern.permute.xlu1 %v1711_v21  ;;  %v445_v62 = vmul.f32 %v1363_v44, %v442_v20  ;;  %v1381_v20 = vld [vmem:[%s2490_s2 + $0x118] sm:$0xff] }
  0xe6   : > { %872 = vperm.xlu1 %1603, %v1806_v2  }
  0xe9   : > { %v517_v22 = vpop.permute.xlu1 %516 }
  0xea   : > { %1604 = vset.pattern.permute.xlu1 %v1702_v30  ;;  %v520_v58 = vmul.f32 %v1373_v1, %v517_v22 }
  0xeb   : > { %887 = vperm.xlu1 %1604, %v1806_v2  }
  0xee   : > { %v1953_v23 = vpop.permute.xlu1 %531 }
  0xef   : > { %1606 = vset.pattern.permute.xlu1 %v1709_v13 }
  0xf0   : > { %786 = vperm.xlu1 %1606, %v1816_v9  }
  0xf3   : > { %v1956_v25 = vpop.permute.xlu1 %602 }
  0xf4   : > { %1607 = vset.pattern.permute.xlu1 %v1710_v15  ;;  %v402_v15 = vadd.f32 %v400_v63, %v346_v4 }
  0xf5   : > { %816 = vperm.xlu1 %1607, %v1816_v9  }
  0xf8   : > { %v1959_v26 = vpop.permute.xlu1 %632 }
  0xf9   : > { %1608 = vset.pattern.permute.xlu1 %v1712_v27 }
  0xfa   : > { %857 = vperm.xlu1 %1608, %v1806_v2  }
  0xfd   : > { %v502_v28 = vpop.permute.xlu1 %501 }
  0xfe   : > { %1609 = vset.pattern.permute.xlu1 %v1713_v29  ;;  %v505_v3 = vmul.f32 %v1371_v56, %v502_v28  ;;  %v462_v28 = vadd.f32 %v460_v5, %v402_v15  ;;  %v1350_v15 = vld [vmem:[%s2490_s2 + $0x20] sm:$0xff] }
  0xff   : > { %902 = vperm.xlu1 %1609, %v1806_v2  }
 0x102   : > { %v1963_v30 = vpop.permute.xlu1 %546 }
 0x103   : > { %1611 = vset.pattern.permute.xlu1 %v1696_v24  ;;  %v1978_v24 = vpop.permute.xlu0 %486 }
 0x104   : > { %846 = vperm.xlu1 %1611, %v1816_v9  }
 0x107   : > { %v1967_v31 = vpop.permute.xlu1 %591  ;;  %v1982_v37 = vpop.permute.xlu0 %572 }
 0x108   : > { %1612 = vset.pattern.permute.xlu1 %v1711_v21 }
 0x109   : > { %876 = vperm.xlu1 %1612, %v1816_v9  }
 0x10b   : > { %v577_v39 = vpop.permute.xlu0 %576 }
 0x10c   : > { %v1970_v32 = vpop.permute.xlu1 %617  ;;  %v580_v42 = vmul.f32 %v1381_v20, %v577_v39  ;;  %v1366_v20 = vld [vmem:[%s2490_s2 + $0xa0] sm:$0xff] }
 0x10d   : > { %1614 = vset.pattern.permute.xlu1 %v1712_v27 }
 0x10e   : > { %861 = vperm.xlu1 %1614, %v1816_v9  }
 0x10f   : > { %v1992_v43 = vpop.permute.xlu0 %557 }
 0x111   : > { %v1973_v33 = vpop.permute.xlu1 %692 }
 0x112   : > { %1615 = vset.pattern.permute.xlu1 %v1713_v29 }
 0x113   : > { %906 = vperm.xlu1 %1615, %v1816_v9   ;;  %v321_v9 = vld [vmem:[%s2490_s2 + $0x8] sm:$0xff]  ;;  %v562_v57 = vpop.permute.xlu0 %561 }
 0x114   : > { %v333_v50 = vmul.f32 %v1928_v11, %v321_v9  ;;  %v565_v21 = vmul.f32 %v1379_v6, %v562_v57  ;;  %v522_v9 = vadd.f32 %v520_v58, %v462_v28  ;;  %v1358_v58 = vld [vmem:[%s2490_s2 + $0x60] sm:$0xff] }
 0x115   : > { %v1374_v28 = vld [vmem:[%s2490_s2 + $0xe0] sm:$0xff] }
 0x116   : > { %v1976_v2 = vpop.permute.xlu1 %707  ;;  %v387_v0 = vadd.f32 %v385_v49, %v333_v50  ;;  %v582_v61 = vadd.f32 %v580_v42, %v522_v9  ;;  %v414_v42 = vmul.f32 %v1358_v58, %v1874_v35  ;;  %v474_v9 = vmul.f32 %v1366_v20, %v1897_v53  ;;  %v1390_v53 = vld [vmem:[%s2490_s2 + $0x160] sm:$0xff] }
 0x117   : > { %v648_v29 = vpop.permute.xlu0 %647 }
 0x118   : > { %v447_v11 = vadd.f32 %v445_v62, %v387_v0 }
 0x11a   : > { %v507_v27 = vadd.f32 %v505_v3, %v447_v11 }
 0x11b   : > { %v1980_v34 = vpop.permute.xlu1 %606  ;;  %v2033_v49 = vpop.permute.xlu0 %651 }
 0x11c   : > { %v567_v22 = vadd.f32 %v565_v21, %v507_v27  ;;  %v358_v27 = vmul.f32 %v1350_v15, %v1889_v48  ;;  %v534_v48 = vmul.f32 %v1374_v28, %v1900_v54  ;;  %v1388_v54 = vld [vmem:[%s2490_s2 + $0x150] sm:$0xff] }
 0x11d   : > { %v1396_v15 = vld [vmem:[%s2490_s2 + $0x190] sm:$0xff]  ;;  %v639_v28 = vmul.f32 %v1388_v54, %v1959_v26 }
 0x11f   : > { %v2040_v0 = vpop.permute.xlu0 %662 }
 0x120   : > { %v637_v38 = vpop.permute.xlu1 %636 }
 0x121   : > { %v640_v50 = vmul.f32 %v1389_v16, %v637_v38 }
 0x123   : > { %v642_v63 = vadd.f32 %v640_v50, %v582_v61  ;;  %v2046_v3 = vpop.permute.xlu0 %666  ;;  %v1380_v50 = vld [vmem:[%s2490_s2 + $0x110] sm:$0xff] }
 0x125   : > { %v1984_v40 = vpop.permute.xlu1 %677 }
 0x127   : > { %v753_v38 = vpop.permute.xlu0 %752 }
 0x12a   : > { %v2005_v59 = vpop.permute.xlu1 %722 }
 0x12b   : > { %v2050_v6 = vpop.permute.xlu0 %756 }
 0x12f   : > { %v2022_v13 = vpop.permute.xlu1 %767  ;;  %v2063_v21 = vpop.permute.xlu0 %842 }
 0x134   : > { %v622_v44 = vpop.permute.xlu1 %621 }
 0x135   : > { %v625_v45 = vmul.f32 %v1387_v55, %v622_v44  ;;  %v1372_v55 = vld [vmem:[%s2490_s2 + $0xd0] sm:$0xff]  ;;  %v1382_v44 = vld [vmem:[%s2490_s2 + $0x120] sm:$0xff] }
 0x136   : > { %v594_v35 = vmul.f32 %v1382_v44, %v1946_v19  ;;  %v1398_v19 = vld [vmem:[%s2490_s2 + $0x1a0] sm:$0xff]  ;;  %v1404_v44 = vld [vmem:[%s2490_s2 + $0x1d0] sm:$0xff] }
 0x137   : > { %v2035_v56 = vadd.f32 %v625_v45, %v567_v22  ;;  %v416_v22 = vadd.f32 %v414_v42, %v358_v27  ;;  %v519_v45 = vmul.f32 %v1372_v55, %v1925_v10  ;;  %v654_v27 = vmul.f32 %v1390_v53, %v648_v29  ;;  %v1354_v29 = vld [vmem:[%s2490_s2 + $0x40] sm:$0xff] }
 0x138   : > { %v699_v42 = vmul.f32 %v1396_v15, %v1973_v33  ;;  %v1412_v33 = vld [vmem:[%s2490_s2 + $0x210] sm:$0xff]  ;;  %v759_v53 = vmul.f32 %v1404_v44, %v753_v38 }
 0x139   : > { %v697_v62 = vpop.permute.xlu1 %696  ;;  %v476_v61 = vadd.f32 %v474_v9, %v416_v22  ;;  %v714_v9 = vmul.f32 %v1398_v19, %v1976_v2  ;;  %v1352_v2 = vld [vmem:[%s2490_s2 + $0x30] sm:$0xff] }
 0x13a   : > { %v700_v57 = vmul.f32 %v1397_v60, %v697_v62  ;;  %v2084_v60 = vpop.permute.xlu0 %737  ;;  %v1420_v15 = vld [vmem:[%s2490_s2 + $0x250] sm:$0xff]  ;;  %v371_v38 = vmul.f32 %v1352_v2, %v1876_v36 }
 0x13b   : > { %v536_v10 = vadd.f32 %v534_v48, %v476_v61  ;;  %v320_v61 = vld [vmem:[%s2490_s2] sm:$0xff]  ;;  %v1368_v19 = vld [vmem:[%s2490_s2 + $0xb0] sm:$0xff] }
 0x13c   : > { %v2042_v39 = vadd.f32 %v700_v57, %v642_v63  ;;  %v521_v63 = vadd.f32 %v519_v45, %v1885_v46  ;;  %v579_v57 = vmul.f32 %v1380_v50, %v1982_v37  ;;  %v1406_v46 = vld [vmem:[%s2490_s2 + $0x1e0] sm:$0xff]  ;;  %v1376_v36 = vld [vmem:[%s2490_s2 + $0xf0] sm:$0xff] }
 0x13d   : > { %v596_v20 = vadd.f32 %v594_v35, %v536_v10  ;;  %v774_v48 = vmul.f32 %v1406_v46, %v2022_v13  ;;  %v1414_v45 = vld [vmem:[%s2490_s2 + $0x220] sm:$0xff]  ;;  %v1360_v13 = vld [vmem:[%s2490_s2 + $0x70] sm:$0xff]  ;;  %v332_v46 = vmul.f32 %v1882_v41, %v320_v61  ;;  %v549_v2 = vmul.f32 %v1376_v36, %v1943_v18 }
 0x13e   : > { %v2044_v1 = vpop.permute.xlu1 %711  ;;  %v2103_v58 = vpop.permute.xlu0 %741  ;;  %v581_v37 = vadd.f32 %v579_v57, %v521_v63  ;;  %v384_v63 = vmul.f32 %v1354_v29, %v1887_v47  ;;  %v1362_v57 = vld [vmem:[%s2490_s2 + $0x80] sm:$0xff]  ;;  %v429_v47 = vmul.f32 %v1360_v13, %v1892_v51  ;;  %v1392_v18 = vld [vmem:[%s2490_s2 + $0x170] sm:$0xff] }
 0x13f   : > { %v656_v26 = vadd.f32 %v654_v27, %v596_v20 }
 0x140   : > { %v641_v22 = vadd.f32 %v639_v28, %v581_v37  ;;  %v1370_v37 = vld [vmem:[%s2490_s2 + $0xc0] sm:$0xff] }
 0x141   : > { %v716_v54 = vadd.f32 %v714_v9, %v656_v26  ;;  %v444_v9 = vmul.f32 %v1362_v57, %v1895_v52  ;;  %v386_v26 = vadd.f32 %v384_v63, %v332_v46  ;;  %v504_v51 = vmul.f32 %v1370_v37, %v1940_v17  ;;  %v1378_v52 = vld [vmem:[%s2490_s2 + $0x100] sm:$0xff]  ;;  %v1383_v46 = vld [vmem:[%s2490_s2 + $0x128] sm:$0xff] }
 0x142   : > { %v828_v50 = vpop.permute.xlu0 %827  ;;  %v701_v35 = vadd.f32 %v699_v42, %v641_v22  ;;  %v1422_v42 = vld [vmem:[%s2490_s2 + $0x260] sm:$0xff] }
 0x143   : > { %v2048_v4 = vpop.permute.xlu1 %782  ;;  %v776_v20 = vadd.f32 %v774_v48, %v716_v54  ;;  %v834_v27 = vmul.f32 %v1414_v45, %v828_v50  ;;  %v431_v50 = vadd.f32 %v429_v47, %v371_v38  ;;  %v1386_v17 = vld [vmem:[%s2490_s2 + $0x140] sm:$0xff]  ;;  %v564_v54 = vmul.f32 %v1378_v52, %v1992_v43 }
 0x144   : > { %v761_v44 = vadd.f32 %v759_v53, %v701_v35  ;;  %v624_v43 = vmul.f32 %v1386_v17, %v1970_v32  ;;  %v669_v38 = vmul.f32 %v1392_v18, %v2040_v0  ;;  %v1402_v32 = vld [vmem:[%s2490_s2 + $0x1c0] sm:$0xff]  ;;  %v1369_v17 = vld [vmem:[%s2490_s2 + $0xb8] sm:$0xff] }
 0x145   : > { %v836_v22 = vadd.f32 %v834_v27, %v776_v20  ;;  %v1375_v20 = vld [vmem:[%s2490_s2 + $0xe8] sm:$0xff]  ;;  %v744_v36 = vmul.f32 %v1402_v32, %v2084_v60 }
 0x146   : > { %v535_v37 = vmul.f32 %v1375_v20, %v1953_v23  ;;  %v1391_v23 = vld [vmem:[%s2490_s2 + $0x168] sm:$0xff]  ;;  %v832_v52 = vpop.permute.xlu0 %831 }
 0x147   : > { %v1395_v32 = vld [vmem:[%s2490_s2 + $0x188] sm:$0xff] }
 0x148   : > { %v813_v5 = vpop.permute.xlu1 %812 }
 0x149   : > { %v819_v28 = vmul.f32 %v1412_v33, %v813_v5  ;;  %v489_v5 = vmul.f32 %v1368_v19, %v1922_v8  ;;  %v1384_v33 = vld [vmem:[%s2490_s2 + $0x130] sm:$0xff]  ;;  %v446_v8 = vadd.f32 %v444_v9, %v386_v26 }
 0x14b   : > { %v821_v48 = vadd.f32 %v819_v28, %v761_v44  ;;  %v491_v35 = vadd.f32 %v489_v5, %v431_v50  ;;  %v506_v53 = vadd.f32 %v504_v51, %v446_v8  ;;  %v537_v51 = vadd.f32 %v535_v37, %v1920_v7  ;;  %v1399_v7 = vld [vmem:[%s2490_s2 + $0x1a8] sm:$0xff] }
 0x14d   : > { %v2052_v11 = vpop.permute.xlu1 %681  ;;  %v551_v19 = vadd.f32 %v549_v2, %v491_v35  ;;  %v566_v27 = vadd.f32 %v564_v54, %v506_v53  ;;  %v1424_v35 = vld [vmem:[%s2490_s2 + $0x270] sm:$0xff]  ;;  %v715_v53 = vmul.f32 %v1399_v7, %v2044_v1  ;;  %v490_v1 = vmul.f32 %v1369_v17, %v1978_v24 }
 0x14f   : > { %v626_v44 = vadd.f32 %v624_v43, %v566_v27 }
 0x152   : > { %v2072_v16 = vpop.permute.xlu1 %726 }
 0x157   : > { %v2087_v62 = vpop.permute.xlu1 %771 }
 0x15c   : > { %v2109_v55 = vpop.permute.xlu1 %797 }
 0x161   : > { %v873_v10 = vpop.permute.xlu1 %872 }
 0x162   : > { %v879_v29 = vmul.f32 %v1420_v15, %v873_v10  ;;  %v609_v10 = vmul.f32 %v1384_v33, %v1956_v25  ;;  %v1394_v15 = vld [vmem:[%s2490_s2 + $0x180] sm:$0xff]  ;;  %v1400_v25 = vld [vmem:[%s2490_s2 + $0x1b0] sm:$0xff]  ;;  %v1353_v33 = vld [vmem:[%s2490_s2 + $0x38] sm:$0xff] }
 0x163   : > { %v684_v47 = vmul.f32 %v1394_v15, %v1984_v40  ;;  %v729_v0 = vmul.f32 %v1400_v25, %v2005_v59  ;;  %v1410_v40 = vld [vmem:[%s2490_s2 + $0x200] sm:$0xff]  ;;  %v372_v54 = vmul.f32 %v1353_v33, %v1931_v12  ;;  %v1405_v15 = vld [vmem:[%s2490_s2 + $0x1d8] sm:$0xff]  ;;  %v1415_v12 = vld [vmem:[%s2490_s2 + $0x228] sm:$0xff] }
 0x164   : > { %v881_v61 = vadd.f32 %v879_v29, %v821_v48  ;;  %v611_v28 = vadd.f32 %v609_v10, %v551_v19  ;;  %v595_v29 = vmul.f32 %v1383_v46, %v1967_v31  ;;  %v1416_v31 = vld [vmem:[%s2490_s2 + $0x230] sm:$0xff]  ;;  %v1418_v59 = vld [vmem:[%s2490_s2 + $0x240] sm:$0xff]  ;;  %v760_v24 = vmul.f32 %v1405_v15, %v2050_v6 }
 0x165   : > { %v686_v5 = vadd.f32 %v684_v47, %v626_v44  ;;  %v849_v8 = vmul.f32 %v1416_v31, %v2063_v21  ;;  %v835_v44 = vmul.f32 %v1415_v12, %v832_v52  ;;  %v1411_v52 = vld [vmem:[%s2490_s2 + $0x208] sm:$0xff] }
 0x166   : > { %v888_v41 = vpop.permute.xlu1 %887  ;;  %v671_v26 = vadd.f32 %v669_v38, %v611_v28  ;;  %v597_v50 = vadd.f32 %v595_v29, %v537_v51  ;;  %v802_v28 = vpop.permute.xlu0 %801  ;;  %v913_v38 = vld [vmem:[%s2491_s3] sm:$0xff]  ;;  %v685_v51 = vmul.f32 %v1395_v32, %v2052_v11  ;;  %v1401_v11 = vld [vmem:[%s2490_s2 + $0x1b8] sm:$0xff] }
 0x167   : > { %v894_v45 = vmul.f32 %v1422_v42, %v888_v41  ;;  %v1408_v42 = vld [vmem:[%s2490_s2 + $0x1f0] sm:$0xff]  ;;  %v746_v2 = vadd.f32 %v744_v36, %v686_v5  ;;  %v1393_v5 = vld [vmem:[%s2490_s2 + $0x178] sm:$0xff] }
 0x168   : > { %v789_v41 = vmul.f32 %v1408_v42, %v2048_v4  ;;  %v731_v48 = vadd.f32 %v729_v0, %v671_v26  ;;  %v655_v4 = vmul.f32 %v1391_v23, %v2033_v49  ;;  %v1407_v49 = vld [vmem:[%s2490_s2 + $0x1e8] sm:$0xff]  ;;  %v1413_v42 = vld [vmem:[%s2490_s2 + $0x218] sm:$0xff]  ;;  %v687_v7 = vadd.f32 %v685_v51, %v2035_v56 }
 0x169   : > { %v896_v13 = vadd.f32 %v894_v45, %v836_v22  ;;  %v1361_v22 = vld [vmem:[%s2490_s2 + $0x78] sm:$0xff]  ;;  %v804_v45 = vmul.f32 %v1410_v40, %v2109_v55  ;;  %v775_v19 = vmul.f32 %v1407_v49, %v2087_v62  ;;  %v1423_v26 = vld [vmem:[%s2490_s2 + $0x268] sm:$0xff] }
 0x16a   : > { %v430_v55 = vmul.f32 %v1361_v22, %v1934_v14  ;;  %v657_v10 = vadd.f32 %v655_v4, %v597_v50  ;;  %v1377_v14 = vld [vmem:[%s2490_s2 + $0xf8] sm:$0xff]  ;;  %v892_v6 = vpop.permute.xlu0 %891  ;;  %v1419_v56 = vld [vmem:[%s2490_s2 + $0x248] sm:$0xff] }
 0x16b   : > { %v2172_v63 = vadd.f32 %v896_v13, %v881_v61  ;;  %v2174_v57 = vpop.permute.xlu1 %786  ;;  %v791_v61 = vadd.f32 %v789_v41, %v731_v48  ;;  %v806_v21 = vadd.f32 %v804_v45, %v746_v2  ;;  %v550_v37 = vmul.f32 %v1377_v14, %v1963_v30  ;;  %v1385_v62 = vld [vmem:[%s2490_s2 + $0x138] sm:$0xff]  ;;  %v1403_v41 = vld [vmem:[%s2490_s2 + $0x1c8] sm:$0xff] }
 0x16c   : > { %v432_v27 = vadd.f32 %v430_v55, %v372_v54  ;;  %v717_v46 = vadd.f32 %v715_v53, %v657_v10  ;;  %v610_v36 = vmul.f32 %v1385_v62, %v1980_v34  ;;  %v1421_v22 = vld [vmem:[%s2490_s2 + $0x258] sm:$0xff]  ;;  %v895_v45 = vmul.f32 %v1423_v26, %v892_v6 }
 0x16d   : > { %v851_v43 = vadd.f32 %v849_v8, %v791_v61  ;;  %v670_v34 = vmul.f32 %v1393_v5, %v2046_v3  ;;  %v745_v4 = vmul.f32 %v1403_v41, %v2103_v58  ;;  %v730_v3 = vmul.f32 %v1401_v11, %v2072_v16  ;;  %v1425_v10 = vld [vmem:[%s2490_s2 + $0x278] sm:$0xff] }
 0x16e   : > { %v777_v0 = vadd.f32 %v775_v19, %v717_v46  ;;  %v492_v23 = vadd.f32 %v490_v1, %v432_v27  ;;  %v805_v61 = vmul.f32 %v1411_v52, %v802_v28  ;;  %v1428_v27 = vld [vmem:[%s313_s15] ss:$0 sm:$0xff] }
 0x16f   : > { %v747_v55 = vadd.f32 %v745_v4, %v687_v7 }
 0x170   : > { %v2201_v9 = vpop.permute.xlu1 %816  ;;  %v837_v48 = vadd.f32 %v835_v44, %v777_v0 }
 0x172   : > { %v897_v58 = vadd.f32 %v895_v45, %v837_v48 }
 0x175   : > { %v858_v60 = vpop.permute.xlu1 %857 }
 0x176   : > { %v864_v13 = vmul.f32 %v1418_v59, %v858_v60  ;;  %v552_v59 = vadd.f32 %v550_v37, %v492_v23  ;;  %v762_v60 = vadd.f32 %v760_v24, %v2042_v39  ;;  %v1409_v39 = vld [vmem:[%s2490_s2 + $0x1f8] sm:$0xff] }
 0x178   : > { %v866_v20 = vadd.f32 %v864_v13, %v806_v21  ;;  %v612_v50 = vadd.f32 %v610_v36, %v552_v59  ;;  %v1417_v13 = vld [vmem:[%s2490_s2 + $0x238] sm:$0xff]  ;;  %v1715_v59 = vmov 64  }
 0x179   : > { %1616 = vset.pattern.permute.xlu1 %v1715_v59 }
 0x17a   : > { %v903_v18 = vpop.permute.xlu1 %902  ;;  %v915_v29 = vadd.f32 %v913_v38, %v866_v20  ;;  %v672_v49 = vadd.f32 %v670_v34, %v612_v50 }
 0x17b   : > { %v909_v25 = vmul.f32 %v1424_v35, %v903_v18  ;;  %v790_v35 = vmul.f32 %v1409_v39, %v2174_v57  ;;  %v807_v18 = vadd.f32 %v805_v61, %v747_v55  ;;  %v1718_v39 = vmov 66  }
 0x17c   : > { %v732_v21 = vadd.f32 %v730_v3, %v672_v49  ;;  %v1719_v3 = vmov 71   ;;  %v1722_v61 = vmov 69   ;;  %v1725_v55 = vmov 80  }
 0x17d   : > { %v911_v47 = vadd.f32 %v909_v25, %v851_v43  ;;  %v914_v25 = vld [vmem:[%s2491_s3 + $0x8] sm:$0xff]  ;;  %v1726_v49 = vmov 72  }
 0x17e   : > { %v792_v14 = vadd.f32 %v790_v35, %v732_v21  ;;  %v1727_v35 = vmov 83   ;;  %v1730_v21 = vmov 75  }
 0x17f   : > { %v919_v40 = vadd.f32 %v2172_v63, %v911_v47  ;;  %v847_v30 = vpop.permute.xlu1 %846  ;;  %v820_v63 = vmul.f32 %v1413_v42, %v2201_v9 }
 0x180   : > { %v850_v16 = vmul.f32 %v1417_v13, %v847_v30  ;;  %v1723_v13 = vmov 77  }
 0x181   : > { %v921_v31 = vadd.f32 %v919_v40, %v915_v29  ;;  %v822_v33 = vadd.f32 %v820_v63, %v762_v60 }
 0x182   : > { %v852_v19 = vadd.f32 %v850_v16, %v792_v14  ;;  %v1731_v16 = vmov 89   ;;  %v1735_v14 = vmov 95  }
 0x183   : > { %1648 = vtanh.f32 %v921_v31  ;;  %v1426_v47 = vmul.f32 -1.442695, %v921_v31 }
 0x184   : > { %v877_v9 = vpop.permute.xlu1 %876 }
 0x185   : > { %v880_v8 = vmul.f32 %v1421_v22, %v877_v9  ;;  %v1716_v22 = vmov 65  }
 0x186   : > { %1617 = vset.pattern.permute.xlu0 %v1716_v22 }
 0x187   : > { %v882_v2 = vadd.f32 %v880_v8, %v822_v33  ;;  %v1717_v8 = vmov 68  }
 0x189   : > { %v918_v17 = vadd.f32 %v897_v58, %v882_v2  ;;  %v862_v53 = vpop.permute.xlu1 %861  ;;  %v1720_v58 = vmov 67   ;;  %v1721_v2 = vmov 74  }
 0x18a   : > { %v865_v54 = vmul.f32 %v1419_v56, %v862_v53  ;;  %v1724_v56 = vmov 70   ;;  %v1729_v53 = vmov 86  }
 0x18c   : > { %v867_v20 = vadd.f32 %v865_v54, %v807_v18  ;;  %v1732_v54 = vmov 76   ;;  %v1734_v18 = vmov 78  }
 0x18e   : > { %v907_v15 = vpop.permute.xlu1 %906  ;;  %v916_v12 = vadd.f32 %v914_v25, %v867_v20  ;;  %v1738_v20 = vmov 82   ;;  %v1741_v25 = vmov 87  }
 0x18f   : > { %v910_v43 = vmul.f32 %v1425_v10, %v907_v15  ;;  %v1733_v10 = vmov 92   ;;  %v1736_v15 = vmov 79  }
 0x190   : > { %v1649_v57 = vpop.eup %1648 }
 0x191   : > { %v912_v1 = vadd.f32 %v910_v43, %v852_v19  ;;  %950 = vrot.lane.b32.xlu0 %v1649_v57, %s1714_s18  ;;  %v1737_v19 = vmov 81   ;;  %v1739_v43 = vmov 84   ;;  %v1740_v57 = vmov 85  }
 0x193   : > { %v920_v28 = vadd.f32 %v918_v17, %v912_v1  ;;  %v1728_v17 = vmov 73   ;;  %v1742_v1 = vmov 88  }
 0x195   : > { %v922_v38 = vadd.f32 %v920_v28, %v916_v12  ;;  %943 = vrot.lane.b32.xlu0 %v1428_v27, %s1714_s18  ;;  %v1743_v27 = vmov 90   ;;  %v1744_v12 = vmov 91   ;;  %v1745_v28 = vmov 93  }
 0x197   : > { %1650 = vtanh.f32 %v922_v38  ;;  %v1427_v24 = vmul.f32 -1.442695, %v922_v38  ;;  %v1746_v38 = vmov 94  }
 0x198   : > { %1652 = vpow2.f32 %v1426_v47 }
 0x1a4   : > { %v1651_v46 = vpop.eup %1650 }
 0x1a5   : > { %952 = vrot.lane.b32.xlu1 %v1651_v46, %s1714_s18  ;;  %v1653_v37 = vpop.eup %1652 }
 0x1a6   : > { %v929_v62 = vadd.f32 1.0, %v1653_v37 }
 0x1a8   : > { %1654 = vrcp.f32 %v929_v62 }
 0x1a9   : > { %1656 = vpow2.f32 %v1427_v24 }
 0x1b5   : > { %v1655_v32 = vpop.eup %1654 }
 0x1b6   : > { %v1657_v42 = vpop.eup %1656 }
 0x1b7   : > { %v930_v29 = vadd.f32 1.0, %v1657_v42 }
 0x1b9   : > { %1658 = vrcp.f32 %v930_v29 }
 0x1c6   : > { %v1659_v40 = vpop.eup %1658 }
 0x203   : > { %v951_v44 = vpop.permute.xlu0 %950 }
 0x204   : > { %v956_v0 = vmul.f32 %v1655_v32, %v951_v44 }
 0x206   : > { %960 = vrot.lane.b32.xlu1 %v956_v0, %s1714_s18 }
 0x207   : > { %v944_v26 = vpop.permute.xlu0 %943 }
 0x208   : > { %v946_v6 = vmul.f32 %v1655_v32, %v944_v26  ;;  %v947_v51 = vmul.f32 %v1659_v40, %v944_v26 }
 0x217   : > { %v953_v30 = vpop.permute.xlu1 %952 }
 0x218   : > { %v957_v23 = vmul.f32 %v1659_v40, %v953_v30 }
 0x21a   : > { %962 = vrot.lane.b32.xlu0 %v957_v23, %s1714_s18 }
 0x278   : > { %v961_v5 = vpop.permute.xlu1 %960 }
 0x279   : > { %v966_v36 = vadd.f32 %v961_v5, %v946_v6 }
 0x27b   : > { %1660 = vtanh.f32 %v966_v36 }
 0x288   : > { %v1661_v41 = vpop.eup %1660 }
 0x289   : > { %972 = vrot.lane.b32.xlu1 %v1661_v41, %s1714_s18 }
 0x28c   : > { %v963_v63 = vpop.permute.xlu0 %962 }
 0x28d   : > { %v967_v31 = vadd.f32 %v963_v63, %v947_v51 }
 0x28f   : > { %1662 = vtanh.f32 %v967_v31 }
 0x29c   : > { %v1663_v48 = vpop.eup %1662 }
 0x29d   : > { %974 = vrot.lane.b32.xlu0 %v1663_v48, %s1714_s18  ;;  %v1433_v48 = vld [vmem:[%s2492_s4 + $0x28] sm:$0xff] }
 0x2fb   : > { %v973_v45 = vpop.permute.xlu1 %972 }
 0x2fc   : > { %v978_v60 = vmul.f32 %v1655_v32, %v973_v45  ;;  %v1432_v45 = vld [vmem:[%s2492_s4 + $0x20] sm:$0xff] }
 0x2fe   : > { %v981_v34 = vrot.slane %v978_v60, 4 }
 0x300   : > { %v983_v11 = vadd.f32 %v981_v34, %v978_v60  ;;  %v1435_v60 = vld [vmem:[%s2492_s4 + $0x38] sm:$0xff] }
 0x301   : > { %v1431_v34 = vld [vmem:[%s2492_s4 + $0x18] sm:$0xff] }
 0x30f   : > { %v975_v4 = vpop.permute.xlu0 %974 }
 0x310   : > { %v979_v9 = vmul.f32 %v1659_v40, %v975_v4  ;;  %v1429_v4 = vld [vmem:[%s2492_s4 + $0x8] sm:$0xff] }
 0x312   : > { %v984_v50 = vadd.f32 %v983_v11, %v979_v9  ;;  %v986_v7 = vrot.slane %v979_v9, 4  ;;  %v1434_v11 = vld [vmem:[%s2492_s4 + $0x30] sm:$0xff]  ;;  %v1437_v9 = vld [vmem:[%s2492_s4 + $0x48] sm:$0xff] }
 0x314   : > { %v989_v52 = vrot.slane %v984_v50, 4 }
 0x316   : > { %v2324_v33 = vsel %vm991_vm0, %v986_v7, %v989_v52  ;;  %v993_v52 = vld [vmem:[%s2492_s4] sm:$0xff] }
 0x317   : > { %1003 = vperm.xlu0 %1617, %v2324_v33   ;;  %996 = vperm.xlu1 %1616, %v2324_v33  }
 0x31b   : > { %1620 = vset.pattern.permute.xlu0 %v1717_v8  ;;  %1618 = vset.pattern.permute.xlu1 %v1718_v39  ;;  %v1436_v8 = vld [vmem:[%s2492_s4 + $0x40] sm:$0xff]  ;;  %v1439_v39 = vld [vmem:[%s2492_s4 + $0x58] sm:$0xff] }
 0x31c   : > { %1024 = vperm.xlu0 %1620, %v2324_v33   ;;  %1010 = vperm.xlu1 %1618, %v2324_v33  }
 0x320   : > { %1623 = vset.pattern.permute.xlu0 %v1719_v3  ;;  %1619 = vset.pattern.permute.xlu1 %v1720_v58  ;;  %v1430_v58 = vld [vmem:[%s2492_s4 + $0x10] sm:$0xff] }
 0x321   : > { %1048 = vperm.xlu0 %1623, %v2324_v33   ;;  %1017 = vperm.xlu1 %1619, %v2324_v33  }
 0x325   : > { %1626 = vset.pattern.permute.xlu0 %v1721_v2  ;;  %1621 = vset.pattern.permute.xlu1 %v1722_v61 }
 0x326   : > { %1072 = vperm.xlu0 %1626, %v2324_v33   ;;  %1032 = vperm.xlu1 %1621, %v2324_v33  }
 0x32a   : > { %1629 = vset.pattern.permute.xlu0 %v1723_v13  ;;  %1622 = vset.pattern.permute.xlu1 %v1724_v56 }
 0x32b   : > { %1096 = vperm.xlu0 %1629, %v2324_v33   ;;  %1040 = vperm.xlu1 %1622, %v2324_v33  }
 0x32f   : > { %1632 = vset.pattern.permute.xlu0 %v1725_v55  ;;  %1624 = vset.pattern.permute.xlu1 %v1726_v49  ;;  %v1440_v49 = vld [vmem:[%s2492_s4 + $0x60] sm:$0xff] }
 0x330   : > { %1120 = vperm.xlu0 %1632, %v2324_v33   ;;  %1056 = vperm.xlu1 %1624, %v2324_v33  }
 0x334   : > { %1635 = vset.pattern.permute.xlu0 %v1727_v35  ;;  %1625 = vset.pattern.permute.xlu1 %v1728_v17  ;;  %v1443_v35 = vld [vmem:[%s2492_s4 + $0x78] sm:$0xff] }
 0x335   : > { %1144 = vperm.xlu0 %1635, %v2324_v33   ;;  %1064 = vperm.xlu1 %1625, %v2324_v33  }
 0x339   : > { %1638 = vset.pattern.permute.xlu0 %v1729_v53  ;;  %1627 = vset.pattern.permute.xlu1 %v1730_v21 }
 0x33a   : > { %1168 = vperm.xlu0 %1638, %v2324_v33   ;;  %1080 = vperm.xlu1 %1627, %v2324_v33  }
 0x33e   : > { %1641 = vset.pattern.permute.xlu0 %v1731_v16  ;;  %1628 = vset.pattern.permute.xlu1 %v1732_v54  ;;  %v1438_v54 = vld [vmem:[%s2492_s4 + $0x50] sm:$0xff] }
 0x33f   : > { %1192 = vperm.xlu0 %1641, %v2324_v33   ;;  %1088 = vperm.xlu1 %1628, %v2324_v33  }
 0x343   : > { %1644 = vset.pattern.permute.xlu0 %v1733_v10  ;;  %1630 = vset.pattern.permute.xlu1 %v1734_v18 }
 0x344   : > { %1216 = vperm.xlu0 %1644, %v2324_v33   ;;  %1104 = vperm.xlu1 %1630, %v2324_v33  }
 0x348   : > { %1647 = vset.pattern.permute.xlu0 %v1735_v14  ;;  %1631 = vset.pattern.permute.xlu1 %v1736_v15 }
 0x349   : > { %1240 = vperm.xlu0 %1647, %v2324_v33   ;;  %1112 = vperm.xlu1 %1631, %v2324_v33  }
 0x34d   : > { %1633 = vset.pattern.permute.xlu1 %v1737_v19  ;;  %v1441_v19 = vld [vmem:[%s2492_s4 + $0x68] sm:$0xff] }
 0x34e   : > { %1128 = vperm.xlu1 %1633, %v2324_v33  }
 0x352   : > { %1634 = vset.pattern.permute.xlu1 %v1738_v20 }
 0x353   : > { %1136 = vperm.xlu1 %1634, %v2324_v33  }
 0x357   : > { %1636 = vset.pattern.permute.xlu1 %v1739_v43 }
 0x358   : > { %1152 = vperm.xlu1 %1636, %v2324_v33  }
 0x35c   : > { %1637 = vset.pattern.permute.xlu1 %v1740_v57  ;;  %v1442_v57 = vld [vmem:[%s2492_s4 + $0x70] sm:$0xff] }
 0x35d   : > { %1160 = vperm.xlu1 %1637, %v2324_v33  }
 0x361   : > { %1639 = vset.pattern.permute.xlu1 %v1741_v25 }
 0x362   : > { %1176 = vperm.xlu1 %1639, %v2324_v33  }
 0x366   : > { %1640 = vset.pattern.permute.xlu1 %v1742_v1  ;;  %v1445_v1 = vld [vmem:[%s2492_s4 + $0x88] sm:$0xff] }
 0x367   : > { %1184 = vperm.xlu1 %1640, %v2324_v33  }
 0x36b   : > { %1642 = vset.pattern.permute.xlu1 %v1743_v27 }
 0x36c   : > { %1200 = vperm.xlu1 %1642, %v2324_v33  }
 0x370   : > { %1643 = vset.pattern.permute.xlu1 %v1744_v12 }
 0x371   : > { %1208 = vperm.xlu1 %1643, %v2324_v33  }
 0x375   : > { %1645 = vset.pattern.permute.xlu1 %v1745_v28 }
 0x376   : > { %1224 = vperm.xlu1 %1645, %v2324_v33  }
 0x37a   : > { %1646 = vset.pattern.permute.xlu1 %v1746_v38 }
 0x37b   : > { %1232 = vperm.xlu1 %1646, %v2324_v33  }
 0x392   : > { %v997_v46 = vpop.permute.xlu1 %996  ;;  %v1004_v0 = vpop.permute.xlu0 %1003 }
 0x393   : > { %v1006_v13 = vmul.f32 %v1429_v4, %v1004_v0  ;;  %v999_v17 = vmul.f32 %v997_v46, %v993_v52  ;;  %v1446_v46 = vld [vmem:[%s2492_s4 + $0x90] sm:$0xff]  ;;  %v1455_v4 = vld [vmem:[%s2492_s4 + $0xd8] sm:$0xff] }
 0x397   : > { %v1011_v47 = vpop.permute.xlu1 %1010  ;;  %v1025_v40 = vpop.permute.xlu0 %1024 }
 0x398   : > { %v1027_v3 = vmul.f32 %v1432_v45, %v1025_v40  ;;  %v1013_v16 = vmul.f32 %v1430_v58, %v1011_v47  ;;  %v1449_v47 = vld [vmem:[%s2492_s4 + $0xa8] sm:$0xff]  ;;  %v1448_v40 = vld [vmem:[%s2492_s4 + $0xa0] sm:$0xff] }
 0x39a   : > { %v1028_v14 = vadd.f32 %v1027_v3, %v999_v17 }
 0x39c   : > { %v1018_v37 = vpop.permute.xlu1 %1017  ;;  %v1049_v23 = vpop.permute.xlu0 %1048 }
 0x39d   : > { %v1051_v2 = vmul.f32 %v1435_v60, %v1049_v23  ;;  %v1020_v61 = vmul.f32 %v1431_v34, %v1018_v37  ;;  %v1451_v23 = vld [vmem:[%s2492_s4 + $0xb8] sm:$0xff] }
 0x39f   : > { %v1052_v15 = vadd.f32 %v1051_v2, %v1020_v61 }
 0x3a1   : > { %v1033_v62 = vpop.permute.xlu1 %1032  ;;  %v1073_v5 = vpop.permute.xlu0 %1072 }
 0x3a2   : > { %v1035_v33 = vmul.f32 %v1433_v48, %v1033_v62  ;;  %v1075_v37 = vmul.f32 %v1438_v54, %v1073_v5 }
 0x3a4   : > { %v1036_v10 = vadd.f32 %v1035_v33, %v1006_v13 }
 0x3a6   : > { %v1041_v24 = vpop.permute.xlu1 %1040  ;;  %v1097_v41 = vpop.permute.xlu0 %1096 }
 0x3a7   : > { %v1043_v56 = vmul.f32 %v1434_v11, %v1041_v24  ;;  %v1099_v62 = vmul.f32 %v1441_v19, %v1097_v41  ;;  %v1444_v24 = vld [vmem:[%s2492_s4 + $0x80] sm:$0xff]  ;;  %v1450_v11 = vld [vmem:[%s2492_s4 + $0xb0] sm:$0xff] }
 0x3a9   : > { %v1044_v27 = vadd.f32 %v1043_v56, %v1013_v16 }
 0x3ab   : > { %v1057_v32 = vpop.permute.xlu1 %1056  ;;  %v1121_v63 = vpop.permute.xlu0 %1120  ;;  %v1076_v5 = vadd.f32 %v1075_v37, %v1044_v27 }
 0x3ac   : > { %v1059_v53 = vmul.f32 %v1436_v8, %v1057_v32  ;;  %v1447_v32 = vld [vmem:[%s2492_s4 + $0x98] sm:$0xff]  ;;  %v1123_v60 = vmul.f32 %v1444_v24, %v1121_v63  ;;  %v1454_v8 = vld [vmem:[%s2492_s4 + $0xd0] sm:$0xff] }
 0x3ae   : > { %v1060_v28 = vadd.f32 %v1059_v53, %v1028_v14  ;;  %v1459_v53 = vld [vmem:[%s2492_s4 + $0xf8] sm:$0xff] }
 0x3b0   : > { %v1065_v42 = vpop.permute.xlu1 %1064  ;;  %v1145_v59 = vpop.permute.xlu0 %1144 }
 0x3b1   : > { %v1067_v55 = vmul.f32 %v1437_v9, %v1065_v42  ;;  %v1147_v34 = vmul.f32 %v1447_v32, %v1145_v59 }
 0x3b3   : > { %v1068_v12 = vadd.f32 %v1067_v55, %v1036_v10 }
 0x3b5   : > { %v1081_v44 = vpop.permute.xlu1 %1080  ;;  %v2385_v50 = vpop.permute.xlu0 %1168  ;;  %v1100_v41 = vadd.f32 %v1099_v62, %v1068_v12 }
 0x3b6   : > { %v1083_v21 = vmul.f32 %v1439_v39, %v1081_v44  ;;  %v1457_v39 = vld [vmem:[%s2492_s4 + $0xe8] sm:$0xff] }
 0x3b8   : > { %v1084_v38 = vadd.f32 %v1083_v21, %v1052_v15 }
 0x3ba   : > { %v1089_v29 = vpop.permute.xlu1 %1088  ;;  %v1193_v20 = vpop.permute.xlu0 %1192 }
 0x3bb   : > { %v1091_v43 = vmul.f32 %v1440_v49, %v1089_v29 }
 0x3bd   : > { %v1092_v0 = vadd.f32 %v1091_v43, %v1060_v28 }
 0x3bf   : > { %v1105_v30 = vpop.permute.xlu1 %1104  ;;  %v1124_v52 = vadd.f32 %v1123_v60, %v1092_v0 }
 0x3c0   : > { %v1107_v42 = vmul.f32 %v1442_v57, %v1105_v30  ;;  %v1217_v30 = vpop.permute.xlu0 %1216 }
 0x3c4   : > { %v1113_v26 = vpop.permute.xlu1 %1112  ;;  %v1241_v21 = vpop.permute.xlu0 %1240 }
 0x3c5   : > { %v1115_v25 = vmul.f32 %v1443_v35, %v1113_v26  ;;  %v1243_v19 = vmul.f32 %v1459_v53, %v1241_v21 }
 0x3c7   : > { %v1116_v29 = vadd.f32 %v1115_v25, %v1084_v38 }
 0x3c9   : > { %v1129_v6 = vpop.permute.xlu1 %1128  ;;  %v1148_v33 = vadd.f32 %v1147_v34, %v1116_v29 }
 0x3ca   : > { %v1131_v44 = vmul.f32 %v1445_v1, %v1129_v6  ;;  %v1452_v6 = vld [vmem:[%s2492_s4 + $0xc0] sm:$0xff] }
 0x3cc   : > { %v1132_v63 = vadd.f32 %v1131_v44, %v1100_v41 }
 0x3ce   : > { %v2358_v36 = vpop.permute.xlu1 %1136 }
 0x3cf   : > { %v1139_v48 = vmul.f32 %v1446_v46, %v2358_v36  ;;  %v1453_v36 = vld [vmem:[%s2492_s4 + $0xc8] sm:$0xff] }
 0x3d0   : > { %v1195_v56 = vmul.f32 %v1453_v36, %v1193_v20 }
 0x3d3   : > { %v2360_v51 = vpop.permute.xlu1 %1152 }
 0x3d4   : > { %v1155_v59 = vmul.f32 %v1448_v40, %v2360_v51  ;;  %v1171_v51 = vmul.f32 %v1450_v11, %v2385_v50 }
 0x3d6   : > { %v1156_v55 = vadd.f32 %v1155_v59, %v1124_v52 }
 0x3d8   : > { %v1161_v31 = vpop.permute.xlu1 %1160 }
 0x3d9   : > { %v1163_v45 = vmul.f32 %v1449_v47, %v1161_v31  ;;  %v1108_v31 = vadd.f32 %v1107_v42, %v1076_v5  ;;  %v1268_v5 = vld [vmem:[%s2494_s6] sm:$0xf] }
 0x3db   : > { %v1140_v3 = vadd.f32 %v1139_v48, %v1108_v31  ;;  %v1164_v58 = vadd.f32 %v1163_v45, %v1132_v63  ;;  %v1271_v45 = vld [vmem:[%s2495_s7] sm:$0xf] }
 0x3dd   : > { %v2362_v22 = vpop.permute.xlu1 %1176  ;;  %v1172_v50 = vadd.f32 %v1171_v51, %v1140_v3  ;;  %v1196_v10 = vadd.f32 %v1195_v56, %v1164_v58 }
 0x3de   : > { %v1179_v9 = vmul.f32 %v1451_v23, %v2362_v22  ;;  %v1456_v22 = vld [vmem:[%s2492_s4 + $0xe0] sm:$0xff] }
 0x3df   : > { %v1219_v14 = vmul.f32 %v1456_v22, %v1217_v30  ;;  %v1266_v23 = vld [vmem:[%s2493_s5] sm:$0xf] }
 0x3e0   : > { %v1180_v49 = vadd.f32 %v1179_v9, %v1148_v33 }
 0x3e2   : > { %v2387_v7 = vpop.permute.xlu1 %1184 }
 0x3e3   : > { %v1187_v2 = vmul.f32 %v1452_v6, %v2387_v7  ;;  %v1458_v7 = vld [vmem:[%s2492_s4 + $0xf0] sm:$0xff] }
 0x3e5   : > { %v1188_v16 = vadd.f32 %v1187_v2, %v1156_v55 }
 0x3e7   : > { %v1201_v18 = vpop.permute.xlu1 %1200  ;;  %v1220_v57 = vadd.f32 %v1219_v14, %v1188_v16 }
 0x3e8   : > { %v1203_v35 = vmul.f32 %v1454_v8, %v1201_v18 }
 0x3ea   : > { %v1204_v20 = vadd.f32 %v1203_v35, %v1172_v50 }
 0x3ec   : > { %v1209_v26 = vpop.permute.xlu1 %1208 }
 0x3ed   : > { %v1211_v61 = vmul.f32 %v1455_v4, %v1209_v26 }
 0x3ef   : > { %v1212_v54 = vadd.f32 %v1211_v61, %v1180_v49 }
 0x3f1   : > { %v1225_v13 = vpop.permute.xlu1 %1224  ;;  %v1244_v25 = vadd.f32 %v1243_v19, %v1212_v54 }
 0x3f2   : > { %v1227_v17 = vmul.f32 %v1457_v39, %v1225_v13 }
 0x3f4   : > { %v1228_v43 = vadd.f32 %v1227_v17, %v1196_v10 }
 0x3f6   : > { %v1233_v15 = vpop.permute.xlu1 %1232  ;;  %v1245_v27 = vadd.f32 %v1228_v43, %v1220_v57 }
 0x3f7   : > { %v1235_v18 = vmul.f32 %v1458_v7, %v1233_v15 }
 0x3f9   : > { %v1236_v1 = vadd.f32 %v1235_v18, %v1204_v20 }
 0x3fb   : > { %v1246_v12 = vadd.f32 %v1244_v25, %v1236_v1 }
 0x3fd   : > { %v1247_v28 = vadd.f32 %v1246_v12, %v1245_v27 }
 0x3ff   : > { %v1249_v38 = vrot.slane %v1247_v28, 4 }
 0x401   : > { %v1251_v46 = vadd.f32 %v1249_v38, %v1247_v28 }
 0x403   : > { %v1252_v47 = vsel %vm991_vm0, %v1251_v46, 0.0 }
 0x404   : > { %1253 = vadd.xlane.f32.xlu1 %v1252_v47 }
 0x48d   : > { %v1254_v37 = vpop.xlane.xlu1 %1253 }
 0x48e   : > { %v1256_v62 = vmul.f32 0.0078125, %v1254_v37 }
 0x490   : > { %v1257_v24 = vsub.f32 %v1251_v46, %v1256_v62 }
 0x492   : > { %v1258_v32 = vmul.f32 %v1257_v24, %v1257_v24 }
 0x494   : > { %v1259_v42 = vsel %vm991_vm0, %v1258_v32, 0.0 }
 0x495   : > { %1260 = vadd.xlane.f32.xlu0 %v1259_v42 }
 0x51e   : > { %v1261_v44 = vpop.xlane.xlu0 %1260 }
 0x51f   : > { %v1262_v0 = vmul.f32 0.0078125, %v1261_v44 }
 0x521   : > { %v1263_v29 = vadd.f32 1e-05, %v1262_v0 }
 0x523   : > { %1664 = vrsqrt.f32 %v1263_v29 }
 0x530   : > { %v1665_v40 = vpop.eup %1664 }
 0x531   : > { %v1265_v26 = vmul.f32 %v1665_v40, %v1257_v24 }
 0x533   : > { %v1267_v41 = vmul.f32 %v1266_v23, %v1265_v26 }
 0x535   : > { %v1269_v48 = vadd.f32 %v1268_v5, %v1267_v41 }
 0x537   : > { %v1270_v60 = vmax.f32 %v1269_v48, 0.0 }
 0x539   : > { %v1272_v34 = vmul.f32 %v1271_v45, %v1270_v60 }
 0x53b   : > { %v1273_v30 = vsel %vm991_vm0, %v1272_v34, 0.0 }
 0x53c   : > { %1274 = vadd.xlane.f32.xlu1 %v1273_v30 }
 0x5c5   : > { %v1275_v6 = vpop.xlane.xlu1 %1274 }
 0x5c6   : > { %1277 = vst.msk [vmem:[%s317_s12] sm:$0xf] %vm1276_vm1, %v1275_v6 }
 0x5c7 PF: > { %s18_s27 = sadd.s32 1, %s1672_s27  }
 0x5c8   : > { %p15_p4 = scmp.ge.s32.totalorder %s18_s27, 10  }
 0x5ca   :  { %17 = sbr.rel (!%p15_p4) target bundleno = 1 (0x1), region = 155 }

</bundles_post_ra>
